<compile_context>
chip_gen: v7x
topology: tpu7x:2x2x1
jax: 0.10.0
libtpu: 0.0.40
codegen_flags: <defaults>
</compile_context>

<pallas_src>
import functools

import jax
import jax.numpy as jnp
from jax.experimental import pallas as pl
from jax.experimental.pallas import tpu as pltpu


# ----------------------------- in-kernel helpers ----------------------------

def _gelu_tanh(x):
    # TODO(synk): HF BERT default is exact erf-GELU; tanh approximation used
    # here (EUP-friendly), numerical difference is ~1e-3.
    c = 0.7978845608028654  # sqrt(2/pi), Python float constant
    return 0.5 * x * (1.0 + jnp.tanh(c * (x + 0.044715 * x * x * x)))


def _layernorm(y, g, b, eps):
    mu = jnp.mean(y, axis=-1, keepdims=True)
    yc = y - mu
    var = jnp.mean(yc * yc, axis=-1, keepdims=True)
    return yc * jax.lax.rsqrt(var + eps) * g + b


# ------------------------- fused whole-stack kernel -------------------------

def _bert_stack_kernel(emb_ref, mask_ref, eg_ref, eb_ref,
                       wqkv_ref, bqkv_ref, wo_ref, bo_ref, g1_ref, b1_ref,
                       wi_ref, bi_ref, wf_ref, bf_ref, g2_ref, b2_ref,
                       pw_ref, pb_ref, fw_ref, fb_ref,
                       logits_ref, x_sc,
                       *, batch, seq, num_heads, head_dim, eps):
    """Grid axis = transformer layer.  x_sc (VMEM scratch) carries the
    (B*S, H) activations across layers; hidden stays on the lane axis."""
    layer = pl.program_id(0)
    H = num_heads * head_dim
    M = batch * seq

    # --- embedding LayerNorm, first grid step only ---
    @pl.when(layer == 0)
    def _():
        x_sc[...] = _layernorm(emb_ref[...], eg_ref[...], eb_ref[...], eps)

    x = x_sc[...]                                          # (M, H) f32

    # ---------------- attention sublayer ----------------
    qkv = jnp.dot(x, wqkv_ref[...],
                  preferred_element_type=jnp.float32) + bqkv_ref[...]   # (M, 3H)
    m = mask_ref[...]                                      # (M, M) block-diag additive

    acc = jnp.zeros((M, H), jnp.float32)
    # TODO(synk): at real BERT dims (dh=64, S>=128) pair heads so the
    # contracting dim is 128 and use flash-style KV tiling; static unroll over
    # 4 heads is fine at this toy size.
    for h in range(num_heads):
        lo = h * head_dim
        hi = lo + head_dim
        qh = qkv[:, lo:hi]                                 # 1/sqrt(dh) folded into W_q
        kh = qkv[:, H + lo:H + hi]
        vh = qkv[:, 2 * H + lo:2 * H + hi]
        s = jax.lax.dot_general(qh, kh, (((1,), (1,)), ((), ())),
                                preferred_element_type=jnp.float32) + m  # (M, M)
        s = s - jnp.max(s, axis=-1, keepdims=True)
        p = jnp.exp(s)
        p = p / jnp.sum(p, axis=-1, keepdims=True)
        ctx = jnp.dot(p, vh, preferred_element_type=jnp.float32)         # (M, dh)
        # ctx @ wo == sum_h ctx_h @ wo[h*dh:(h+1)*dh, :]  (avoids a concat)
        acc = acc + jnp.dot(ctx, wo_ref[lo:hi, :],
                            preferred_element_type=jnp.float32)

    y = acc + bo_ref[...] + x                              # out-proj bias + residual
    x1 = _layernorm(y, g1_ref[...], b1_ref[...], eps)

    # ---------------- FFN sublayer ----------------
    hmid = jnp.dot(x1, wi_ref[...], preferred_element_type=jnp.float32) + bi_ref[...]
    hmid = _gelu_tanh(hmid)
    y2 = jnp.dot(hmid, wf_ref[...], preferred_element_type=jnp.float32) + bf_ref[...] + x1
    x2 = _layernorm(y2, g2_ref[...], b2_ref[...], eps)
    x_sc[...] = x2                                         # carry to next layer

    # --------- pooler (dense+tanh on [CLS]) + classifier, last layer ---------
    @pl.when(layer == pl.num_programs(0) - 1)
    def _():
        cls = jnp.concatenate(
            [x2[b * seq:b * seq + 1, :] for b in range(batch)], axis=0)   # (B, H)
        pooled = jnp.tanh(jnp.dot(cls, pw_ref[...],
                                  preferred_element_type=jnp.float32) + pb_ref[...])
        logits = jnp.dot(pooled, fw_ref[...],
                         preferred_element_type=jnp.float32) + fb_ref[...]
        logits_ref[...] = logits.astype(logits_ref.dtype)


def bert_stack(emb, mask_full, sp, *, batch, seq, num_heads, num_layers, cfg):
    """One pallas_call for the full encoder stack + pooler + classifier."""
    M, H = emb.shape
    I = cfg["intermediate_size"]
    C = cfg["num_classes"]
    H3 = 3 * H
    head_dim = H // num_heads
    eps = 1e-12

    def const(shape):                                  # layer-invariant operand
        return pl.BlockSpec(shape, lambda l: (0, 0))

    def per_layer(shape):                              # stacked (L, ...) operand
        return pl.BlockSpec((pl.Squeezed(),) + shape, lambda l: (l, 0, 0))

    grid_spec = pltpu.PrefetchScalarGridSpec(
        num_scalar_prefetch=0,
        grid=(num_layers,),
        in_specs=[
            const((M, H)),                               # summed embeddings
            const((M, M)),                               # block-diag additive mask
            const((1, H)), const((1, H)),                # embedding LN gamma/beta
            per_layer((H, H3)), per_layer((1, H3)),      # W_qkv, b_qkv
            per_layer((H, H)), per_layer((1, H)),        # W_o, b_o
            per_layer((1, H)), per_layer((1, H)),        # LN1 gamma/beta
            per_layer((H, I)), per_layer((1, I)),        # W_i, b_i
            per_layer((I, H)), per_layer((1, H)),        # W_f, b_f
            per_layer((1, H)), per_layer((1, H)),        # LN2 gamma/beta
            const((H, H)), const((1, H)),                # pooler W, b
            const((H, C)), const((1, C)),                # classifier W, b
        ],
        out_specs=pl.BlockSpec((batch, C), lambda l: (0, 0)),
        scratch_shapes=[pltpu.VMEM((M, H), jnp.float32)],   # resident activations
    )

    return pl.pallas_call(
        functools.partial(_bert_stack_kernel, batch=batch, seq=seq,
                          num_heads=num_heads, head_dim=head_dim, eps=eps),
        out_shape=jax.ShapeDtypeStruct((batch, C), emb.dtype),
        grid_spec=grid_spec,
        compiler_params=pltpu.CompilerParams(
            dimension_semantics=("arbitrary",)),         # sequential layer carry
    )(emb, mask_full, sp["emb_ln_g"], sp["emb_ln_b"],
      sp["wqkv"], sp["bqkv"], sp["wo"], sp["bo"], sp["ln1_g"], sp["ln1_b"],
      sp["wi"], sp["bi"], sp["wf"], sp["bf"], sp["ln2_g"], sp["ln2_b"],
      sp["pool_w"], sp["pool_b"], sp["fc_w"], sp["fc_b"])


# ----------------------------- model definition -----------------------------

CFG = dict(
    vocab_size=100,
    hidden_size=32,
    num_layers=2,
    num_heads=4,
    intermediate_size=64,
    max_position=64,
    type_vocab_size=2,
    num_classes=3,
)


def init_params(key, cfg):
    H = cfg["hidden_size"]
    I = cfg["intermediate_size"]
    std = 0.02

    def normal(k, shape):
        return (std * jax.random.normal(k, shape)).astype(jnp.float32)

    keys = iter(jax.random.split(key, 64))
    p = {
        "word_emb": normal(next(keys), (cfg["vocab_size"], H)),
        "pos_emb": normal(next(keys), (cfg["max_position"], H)),
        "tok_emb": normal(next(keys), (cfg["type_vocab_size"], H)),
        "emb_ln_g": jnp.ones((H,), jnp.float32),
        "emb_ln_b": jnp.zeros((H,), jnp.float32),
        "layers": [],
        "pool_w": normal(next(keys), (H, H)),
        "pool_b": jnp.zeros((H,), jnp.float32),
        "fc_w": normal(next(keys), (H, cfg["num_classes"])),
        "fc_b": jnp.zeros((cfg["num_classes"],), jnp.float32),
    }
    for _ in range(cfg["num_layers"]):
        p["layers"].append(dict(
            wq=normal(next(keys), (H, H)), bq=jnp.zeros((H,), jnp.float32),
            wk=normal(next(keys), (H, H)), bk=jnp.zeros((H,), jnp.float32),
            wv=normal(next(keys), (H, H)), bv=jnp.zeros((H,), jnp.float32),
            wo=normal(next(keys), (H, H)), bo=jnp.zeros((H,), jnp.float32),
            ln1_g=jnp.ones((H,), jnp.float32), ln1_b=jnp.zeros((H,), jnp.float32),
            wi=normal(next(keys), (H, I)), bi=jnp.zeros((I,), jnp.float32),
            wf=normal(next(keys), (I, H)), bf=jnp.zeros((H,), jnp.float32),
            ln2_g=jnp.ones((H,), jnp.float32), ln2_b=jnp.zeros((H,), jnp.float32),
        ))
    return p


def prepare_params(params, cfg):
    """One-time (outside jit) weight prep: fuse QKV, fold 1/sqrt(dh) into the
    Q slice, stack all per-layer weights along a leading layer axis."""
    H = cfg["hidden_size"]
    I = cfg["intermediate_size"]
    dh = H // cfg["num_heads"]
    scale = float(dh) ** -0.5      # Python float; folded into wq/bq
    layers = params["layers"]

    def stack(fn):
        return jnp.stack([fn(lp) for lp in layers], axis=0)

    return {
        "word_emb": params["word_emb"],
        "pos_emb": params["pos_emb"],
        "tok_emb": params["tok_emb"],
        "emb_ln_g": params["emb_ln_g"].reshape(1, H),
        "emb_ln_b": params["emb_ln_b"].reshape(1, H),
        "wqkv": stack(lambda lp: jnp.concatenate(
            [lp["wq"] * scale, lp["wk"], lp["wv"]], axis=1)),              # (L,H,3H)
        "bqkv": stack(lambda lp: jnp.concatenate(
            [lp["bq"] * scale, lp["bk"], lp["bv"]], axis=0).reshape(1, 3 * H)),
        "wo": stack(lambda lp: lp["wo"]),                                  # (L,H,H)
        "bo": stack(lambda lp: lp["bo"].reshape(1, H)),
        "ln1_g": stack(lambda lp: lp["ln1_g"].reshape(1, H)),
        "ln1_b": stack(lambda lp: lp["ln1_b"].reshape(1, H)),
        "wi": stack(lambda lp: lp["wi"]),                                  # (L,H,I)
        "bi": stack(lambda lp: lp["bi"].reshape(1, I)),
        "wf": stack(lambda lp: lp["wf"]),                                  # (L,I,H)
        "bf": stack(lambda lp: lp["bf"].reshape(1, H)),
        "ln2_g": stack(lambda lp: lp["ln2_g"].reshape(1, H)),
        "ln2_b": stack(lambda lp: lp["ln2_b"].reshape(1, H)),
        "pool_w": params["pool_w"],
        "pool_b": params["pool_b"].reshape(1, H),
        "fc_w": params["fc_w"],
        "fc_b": params["fc_b"].reshape(1, cfg["num_classes"]),
    }


def bert_classifier_forward(sp, input_ids, attention_mask, token_type_ids, cfg):
    B, S = input_ids.shape
    H = cfg["hidden_size"]

    # --- embeddings: table gathers stay as XLA glue, everything else fused ---
    we = jnp.take(sp["word_emb"], input_ids, axis=0)                  # (B,S,H)
    pe = sp["pos_emb"][:S][None, :, :]                                # (1,S,H)
    te = jnp.take(sp["tok_emb"], token_type_ids, axis=0)              # (B,S,H)
    emb = (we + pe + te).reshape(B * S, H)

    # --- block-diagonal additive mask over flattened B*S tokens:
    #     cross-batch token pairs and padded key positions both get -1e4 ---
    am = attention_mask.astype(jnp.float32)                           # (B, S)
    key_mask = (1.0 - am) * -10000.0                                  # (B, S)
    cross = (1.0 - jnp.eye(B, dtype=jnp.float32)) * -10000.0          # (B, B)
    mask_full = jnp.broadcast_to(
        cross[:, None, :, None] + key_mask[None, None, :, :],
        (B, S, B, S)).reshape(B * S, B * S)

    return bert_stack(emb, mask_full, sp, batch=B, seq=S,
                      num_heads=cfg["num_heads"],
                      num_layers=cfg["num_layers"], cfg=cfg)


# ----------------------------------- main ------------------------------------

if __name__ == "__main__":
    B, S = 2, 8
    key = jax.random.PRNGKey(0)
    k_param, k_ids, k_tok = jax.random.split(key, 3)

    raw_params = init_params(k_param, CFG)
    params = prepare_params(raw_params, CFG)   # QKV fusion / stacking, once, outside jit

    input_ids = jax.random.randint(k_ids, (B, S), 0, CFG["vocab_size"], dtype=jnp.int32)
    attention_mask = jnp.concatenate(
        [jnp.ones((B, S - 2), jnp.int32), jnp.zeros((B, 2), jnp.int32)], axis=1)
    token_type_ids = jnp.concatenate(
        [jnp.zeros((B, S // 2), jnp.int32), jnp.ones((B, S // 2), jnp.int32)], axis=1)

    fwd = jax.jit(functools.partial(bert_classifier_forward, cfg=CFG))
    logits = fwd(params, input_ids, attention_mask, token_type_ids)
    jax.block_until_ready(logits)
    assert logits.shape == (B, CFG["num_classes"])
    print("KERNEL_OK")
</pallas_src>

<mosaic_0001>
module attributes {stable_mosaic.version = 11 : i64} {
  func.func @_bert_stack_kernel(%arg0: i32, %arg1: memref<16x32xf32, #tpu.memory_space<vmem>>, %arg2: memref<16x16xf32, #tpu.memory_space<vmem>>, %arg3: memref<1x32xf32, #tpu.memory_space<vmem>>, %arg4: memref<1x32xf32, #tpu.memory_space<vmem>>, %arg5: memref<1x32x96xf32, #tpu.memory_space<vmem>>, %arg6: memref<1x1x96xf32, #tpu.memory_space<vmem>>, %arg7: memref<1x32x32xf32, #tpu.memory_space<vmem>>, %arg8: memref<1x1x32xf32, #tpu.memory_space<vmem>>, %arg9: memref<1x1x32xf32, #tpu.memory_space<vmem>>, %arg10: memref<1x1x32xf32, #tpu.memory_space<vmem>>, %arg11: memref<1x32x64xf32, #tpu.memory_space<vmem>>, %arg12: memref<1x1x64xf32, #tpu.memory_space<vmem>>, %arg13: memref<1x64x32xf32, #tpu.memory_space<vmem>>, %arg14: memref<1x1x32xf32, #tpu.memory_space<vmem>>, %arg15: memref<1x1x32xf32, #tpu.memory_space<vmem>>, %arg16: memref<1x1x32xf32, #tpu.memory_space<vmem>>, %arg17: memref<32x32xf32, #tpu.memory_space<vmem>>, %arg18: memref<1x32xf32, #tpu.memory_space<vmem>>, %arg19: memref<32x3xf32, #tpu.memory_space<vmem>>, %arg20: memref<1x3xf32, #tpu.memory_space<vmem>>, %arg21: memref<2x3xf32, #tpu.memory_space<vmem>>, %arg22: memref<16x32xf32, #tpu.memory_space<vmem>>) attributes {dimension_semantics = [#tpu.dimension_semantics<arbitrary>], iteration_bounds = array<i64: 2>, scalar_prefetch = 0 : i64, scratch_operands = 1 : i64, tpu.core_type = #tpu.core_type<tc>, window_params = [{pipeline_mode = #tpu.pipeline_mode<synchronous>, transform_indices = @transform_0, window_bounds = array<i64: 16, 32>}, {pipeline_mode = #tpu.pipeline_mode<synchronous>, transform_indices = @transform_1, window_bounds = array<i64: 16, 16>}, {pipeline_mode = #tpu.pipeline_mode<synchronous>, transform_indices = @transform_2, window_bounds = array<i64: 1, 32>}, {pipeline_mode = #tpu.pipeline_mode<synchronous>, transform_indices = @transform_3, window_bounds = array<i64: 1, 32>}, {transform_indices = @transform_4, window_bounds = array<i64: 1, 32, 96>}, {transform_indices = @transform_5, window_bounds = array<i64: 1, 1, 96>}, {transform_indices = @transform_6, window_bounds = array<i64: 1, 32, 32>}, {transform_indices = @transform_7, window_bounds = array<i64: 1, 1, 32>}, {transform_indices = @transform_8, window_bounds = array<i64: 1, 1, 32>}, {transform_indices = @transform_9, window_bounds = array<i64: 1, 1, 32>}, {transform_indices = @transform_10, window_bounds = array<i64: 1, 32, 64>}, {transform_indices = @transform_11, window_bounds = array<i64: 1, 1, 64>}, {transform_indices = @transform_12, window_bounds = array<i64: 1, 64, 32>}, {transform_indices = @transform_13, window_bounds = array<i64: 1, 1, 32>}, {transform_indices = @transform_14, window_bounds = array<i64: 1, 1, 32>}, {transform_indices = @transform_15, window_bounds = array<i64: 1, 1, 32>}, {pipeline_mode = #tpu.pipeline_mode<synchronous>, transform_indices = @transform_16, window_bounds = array<i64: 32, 32>}, {pipeline_mode = #tpu.pipeline_mode<synchronous>, transform_indices = @transform_17, window_bounds = array<i64: 1, 32>}, {pipeline_mode = #tpu.pipeline_mode<synchronous>, transform_indices = @transform_18, window_bounds = array<i64: 32, 3>}, {pipeline_mode = #tpu.pipeline_mode<synchronous>, transform_indices = @transform_19, window_bounds = array<i64: 1, 3>}, {pipeline_mode = #tpu.pipeline_mode<synchronous>, transform_indices = @transform_20, window_bounds = array<i64: 2, 3>}]} {
    %c0_i32 = arith.constant 0 : i32
    %0 = arith.cmpi eq, %arg0, %c0_i32 : i32
    %1 = arith.extui %0 : i1 to i32
    %c0_i32_0 = arith.constant 0 : i32
    %2 = arith.cmpi ne, %1, %c0_i32_0 : i32
    scf.if %2 {
      %c0_86 = arith.constant 0 : index
      %c0_87 = arith.constant 0 : index
      %174 = vector.load %arg1[%c0_86, %c0_87] : memref<16x32xf32, #tpu.memory_space<vmem>>, vector<16x32xf32>
      %c0_88 = arith.constant 0 : index
      %c0_89 = arith.constant 0 : index
      %175 = vector.load %arg3[%c0_88, %c0_89] : memref<1x32xf32, #tpu.memory_space<vmem>>, vector<1x32xf32>
      %c0_90 = arith.constant 0 : index
      %c0_91 = arith.constant 0 : index
      %176 = vector.load %arg4[%c0_90, %c0_91] : memref<1x32xf32, #tpu.memory_space<vmem>>, vector<1x32xf32>
      %cst_92 = arith.constant dense<0.000000e+00> : vector<16xf32>
      %177 = vector.multi_reduction <add>, %174, %cst_92 [1] : vector<16x32xf32> to vector<16xf32>
      %178 = vector.shape_cast %177 : vector<16xf32> to vector<16x1xf32>
      %cst_93 = arith.constant 3.200000e+01 : f32
      %179 = vector.broadcast %cst_93 : f32 to vector<16x1xf32>
      %180 = arith.divf %178, %179 : vector<16x1xf32>
      %181 = vector.broadcast %180 : vector<16x1xf32> to vector<16x32xf32>
      %182 = arith.subf %174, %181 : vector<16x32xf32>
      %183 = arith.mulf %182, %182 : vector<16x32xf32>
      %cst_94 = arith.constant dense<0.000000e+00> : vector<16xf32>
      %184 = vector.multi_reduction <add>, %183, %cst_94 [1] : vector<16x32xf32> to vector<16xf32>
      %185 = vector.shape_cast %184 : vector<16xf32> to vector<16x1xf32>
      %cst_95 = arith.constant 3.200000e+01 : f32
      %186 = vector.broadcast %cst_95 : f32 to vector<16x1xf32>
      %187 = arith.divf %185, %186 : vector<16x1xf32>
      %cst_96 = arith.constant 9.99999996E-13 : f32
      %188 = vector.broadcast %cst_96 : f32 to vector<16x1xf32>
      %189 = arith.addf %187, %188 : vector<16x1xf32>
      %190 = math.rsqrt %189 : vector<16x1xf32>
      %191 = vector.broadcast %190 : vector<16x1xf32> to vector<16x32xf32>
      %192 = arith.mulf %182, %191 : vector<16x32xf32>
      %193 = vector.broadcast %175 : vector<1x32xf32> to vector<16x32xf32>
      %194 = arith.mulf %192, %193 : vector<16x32xf32>
      %195 = vector.broadcast %176 : vector<1x32xf32> to vector<16x32xf32>
      %196 = arith.addf %194, %195 : vector<16x32xf32>
      %c0_97 = arith.constant 0 : index
      %c0_98 = arith.constant 0 : index
      %197 = vector.load %arg22[%c0_97, %c0_98] : memref<16x32xf32, #tpu.memory_space<vmem>>, vector<16x32xf32>
      tpu.vector_store %arg22[%c0_97, %c0_98], %196 {strides = array<i32>} : memref<16x32xf32, #tpu.memory_space<vmem>>, vector<16x32xf32>,
    } else {
    }
    %c0 = arith.constant 0 : index
    %c0_1 = arith.constant 0 : index
    %3 = vector.load %arg22[%c0, %c0_1] : memref<16x32xf32, #tpu.memory_space<vmem>>, vector<16x32xf32>
    %c0_2 = arith.constant 0 : index
    %c0_3 = arith.constant 0 : index
    %c0_4 = arith.constant 0 : index
    %4 = vector.load %arg5[%c0_2, %c0_3, %c0_4] : memref<1x32x96xf32, #tpu.memory_space<vmem>>, vector<1x32x96xf32>
    %5 = vector.shape_cast %4 : vector<1x32x96xf32> to vector<32x96xf32>
    %cst = arith.constant dense<0.000000e+00> : vector<16x96xf32>
    %6 = tpu.matmul %3, %5, %cst {dimension_numbers = #tpu.dot_dimension_numbers<[1], [0], [0], [1], [0, 0, 1, 1], [], []>} : vector<16x32xf32>, vector<32x96xf32>, vector<16x96xf32> -> vector<16x96xf32>
    %c0_5 = arith.constant 0 : index
    %c0_6 = arith.constant 0 : index
    %c0_7 = arith.constant 0 : index
    %7 = vector.load %arg6[%c0_5, %c0_6, %c0_7] : memref<1x1x96xf32, #tpu.memory_space<vmem>>, vector<1x1x96xf32>
    %8 = vector.shape_cast %7 : vector<1x1x96xf32> to vector<1x96xf32>
    %9 = vector.broadcast %8 : vector<1x96xf32> to vector<16x96xf32>
    %10 = arith.addf %6, %9 : vector<16x96xf32>
    %c0_8 = arith.constant 0 : index
    %c0_9 = arith.constant 0 : index
    %11 = vector.load %arg2[%c0_8, %c0_9] : memref<16x16xf32, #tpu.memory_space<vmem>>, vector<16x16xf32>
    %cst_10 = arith.constant 0.000000e+00 : f32
    %12 = vector.broadcast %cst_10 : f32 to vector<16x32xf32>
    %13 = vector.extract_strided_slice %10 {offsets = [0, 0], sizes = [16, 8], strides = [1, 1]} : vector<16x96xf32> to vector<16x8xf32>
    %14 = vector.extract_strided_slice %10 {offsets = [0, 32], sizes = [16, 8], strides = [1, 1]} : vector<16x96xf32> to vector<16x8xf32>
    %15 = vector.extract_strided_slice %10 {offsets = [0, 64], sizes = [16, 8], strides = [1, 1]} : vector<16x96xf32> to vector<16x8xf32>
    %cst_11 = arith.constant dense<0.000000e+00> : vector<16x16xf32>
    %16 = tpu.matmul %13, %14, %cst_11 {dimension_numbers = #tpu.dot_dimension_numbers<[1], [1], [0], [0], [0, 0, 1, 0], [], []>} : vector<16x8xf32>, vector<16x8xf32>, vector<16x16xf32> -> vector<16x16xf32>
    %17 = arith.addf %16, %11 : vector<16x16xf32>
    %cst_12 = arith.constant dense<0xFF800000> : vector<16xf32>
    %18 = vector.multi_reduction <maximumf>, %17, %cst_12 [1] : vector<16x16xf32> to vector<16xf32>
    %19 = vector.shape_cast %18 : vector<16xf32> to vector<16x1xf32>
    %20 = vector.broadcast %19 : vector<16x1xf32> to vector<16x16xf32>
    %21 = arith.subf %17, %20 : vector<16x16xf32>
    %22 = math.exp %21 : vector<16x16xf32>
    %cst_13 = arith.constant dense<0.000000e+00> : vector<16xf32>
    %23 = vector.multi_reduction <add>, %22, %cst_13 [1] : vector<16x16xf32> to vector<16xf32>
    %24 = vector.shape_cast %23 : vector<16xf32> to vector<16x1xf32>
    %25 = vector.broadcast %24 : vector<16x1xf32> to vector<16x16xf32>
    %26 = arith.divf %22, %25 : vector<16x16xf32>
    %cst_14 = arith.constant dense<0.000000e+00> : vector<16x8xf32>
    %27 = tpu.matmul %26, %15, %cst_14 {dimension_numbers = #tpu.dot_dimension_numbers<[1], [0], [0], [1], [0, 0, 1, 1], [], []>} : vector<16x16xf32>, vector<16x8xf32>, vector<16x8xf32> -> vector<16x8xf32>
    %c0_15 = arith.constant 0 : index
    %c0_16 = arith.constant 0 : index
    %c0_17 = arith.constant 0 : index
    %28 = vector.load %arg7[%c0_15, %c0_16, %c0_17] : memref<1x32x32xf32, #tpu.memory_space<vmem>>, vector<1x8x32xf32>
    %29 = vector.shape_cast %28 : vector<1x8x32xf32> to vector<8x32xf32>
    %cst_18 = arith.constant dense<0.000000e+00> : vector<16x32xf32>
    %30 = tpu.matmul %27, %29, %cst_18 {dimension_numbers = #tpu.dot_dimension_numbers<[1], [0], [0], [1], [0, 0, 1, 1], [], []>} : vector<16x8xf32>, vector<8x32xf32>, vector<16x32xf32> -> vector<16x32xf32>
    %31 = arith.addf %12, %30 : vector<16x32xf32>
    %32 = vector.extract_strided_slice %10 {offsets = [0, 8], sizes = [16, 8], strides = [1, 1]} : vector<16x96xf32> to vector<16x8xf32>
    %33 = vector.extract_strided_slice %10 {offsets = [0, 40], sizes = [16, 8], strides = [1, 1]} : vector<16x96xf32> to vector<16x8xf32>
    %34 = vector.extract_strided_slice %10 {offsets = [0, 72], sizes = [16, 8], strides = [1, 1]} : vector<16x96xf32> to vector<16x8xf32>
    %cst_19 = arith.constant dense<0.000000e+00> : vector<16x16xf32>
    %35 = tpu.matmul %32, %33, %cst_19 {dimension_numbers = #tpu.dot_dimension_numbers<[1], [1], [0], [0], [0, 0, 1, 0], [], []>} : vector<16x8xf32>, vector<16x8xf32>, vector<16x16xf32> -> vector<16x16xf32>
    %36 = arith.addf %35, %11 : vector<16x16xf32>
    %cst_20 = arith.constant dense<0xFF800000> : vector<16xf32>
    %37 = vector.multi_reduction <maximumf>, %36, %cst_20 [1] : vector<16x16xf32> to vector<16xf32>
    %38 = vector.shape_cast %37 : vector<16xf32> to vector<16x1xf32>
    %39 = vector.broadcast %38 : vector<16x1xf32> to vector<16x16xf32>
    %40 = arith.subf %36, %39 : vector<16x16xf32>
    %41 = math.exp %40 : vector<16x16xf32>
    %cst_21 = arith.constant dense<0.000000e+00> : vector<16xf32>
    %42 = vector.multi_reduction <add>, %41, %cst_21 [1] : vector<16x16xf32> to vector<16xf32>
    %43 = vector.shape_cast %42 : vector<16xf32> to vector<16x1xf32>
    %44 = vector.broadcast %43 : vector<16x1xf32> to vector<16x16xf32>
    %45 = arith.divf %41, %44 : vector<16x16xf32>
    %cst_22 = arith.constant dense<0.000000e+00> : vector<16x8xf32>
    %46 = tpu.matmul %45, %34, %cst_22 {dimension_numbers = #tpu.dot_dimension_numbers<[1], [0], [0], [1], [0, 0, 1, 1], [], []>} : vector<16x16xf32>, vector<16x8xf32>, vector<16x8xf32> -> vector<16x8xf32>
    %c0_23 = arith.constant 0 : index
    %c8 = arith.constant 8 : index
    %c0_24 = arith.constant 0 : index
    %47 = vector.load %arg7[%c0_23, %c8, %c0_24] : memref<1x32x32xf32, #tpu.memory_space<vmem>>, vector<1x8x32xf32>
    %48 = vector.shape_cast %47 : vector<1x8x32xf32> to vector<8x32xf32>
    %cst_25 = arith.constant dense<0.000000e+00> : vector<16x32xf32>
    %49 = tpu.matmul %46, %48, %cst_25 {dimension_numbers = #tpu.dot_dimension_numbers<[1], [0], [0], [1], [0, 0, 1, 1], [], []>} : vector<16x8xf32>, vector<8x32xf32>, vector<16x32xf32> -> vector<16x32xf32>
    %50 = arith.addf %31, %49 : vector<16x32xf32>
    %51 = vector.extract_strided_slice %10 {offsets = [0, 16], sizes = [16, 8], strides = [1, 1]} : vector<16x96xf32> to vector<16x8xf32>
    %52 = vector.extract_strided_slice %10 {offsets = [0, 48], sizes = [16, 8], strides = [1, 1]} : vector<16x96xf32> to vector<16x8xf32>
    %53 = vector.extract_strided_slice %10 {offsets = [0, 80], sizes = [16, 8], strides = [1, 1]} : vector<16x96xf32> to vector<16x8xf32>
    %cst_26 = arith.constant dense<0.000000e+00> : vector<16x16xf32>
    %54 = tpu.matmul %51, %52, %cst_26 {dimension_numbers = #tpu.dot_dimension_numbers<[1], [1], [0], [0], [0, 0, 1, 0], [], []>} : vector<16x8xf32>, vector<16x8xf32>, vector<16x16xf32> -> vector<16x16xf32>
    %55 = arith.addf %54, %11 : vector<16x16xf32>
    %cst_27 = arith.constant dense<0xFF800000> : vector<16xf32>
    %56 = vector.multi_reduction <maximumf>, %55, %cst_27 [1] : vector<16x16xf32> to vector<16xf32>
    %57 = vector.shape_cast %56 : vector<16xf32> to vector<16x1xf32>
    %58 = vector.broadcast %57 : vector<16x1xf32> to vector<16x16xf32>
    %59 = arith.subf %55, %58 : vector<16x16xf32>
    %60 = math.exp %59 : vector<16x16xf32>
    %cst_28 = arith.constant dense<0.000000e+00> : vector<16xf32>
    %61 = vector.multi_reduction <add>, %60, %cst_28 [1] : vector<16x16xf32> to vector<16xf32>
    %62 = vector.shape_cast %61 : vector<16xf32> to vector<16x1xf32>
    %63 = vector.broadcast %62 : vector<16x1xf32> to vector<16x16xf32>
    %64 = arith.divf %60, %63 : vector<16x16xf32>
    %cst_29 = arith.constant dense<0.000000e+00> : vector<16x8xf32>
    %65 = tpu.matmul %64, %53, %cst_29 {dimension_numbers = #tpu.dot_dimension_numbers<[1], [0], [0], [1], [0, 0, 1, 1], [], []>} : vector<16x16xf32>, vector<16x8xf32>, vector<16x8xf32> -> vector<16x8xf32>
    %c0_30 = arith.constant 0 : index
    %c16 = arith.constant 16 : index
    %c0_31 = arith.constant 0 : index
    %66 = vector.load %arg7[%c0_30, %c16, %c0_31] : memref<1x32x32xf32, #tpu.memory_space<vmem>>, vector<1x8x32xf32>
    %67 = vector.shape_cast %66 : vector<1x8x32xf32> to vector<8x32xf32>
    %cst_32 = arith.constant dense<0.000000e+00> : vector<16x32xf32>
    %68 = tpu.matmul %65, %67, %cst_32 {dimension_numbers = #tpu.dot_dimension_numbers<[1], [0], [0], [1], [0, 0, 1, 1], [], []>} : vector<16x8xf32>, vector<8x32xf32>, vector<16x32xf32> -> vector<16x32xf32>
    %69 = arith.addf %50, %68 : vector<16x32xf32>
    %70 = vector.extract_strided_slice %10 {offsets = [0, 24], sizes = [16, 8], strides = [1, 1]} : vector<16x96xf32> to vector<16x8xf32>
    %71 = vector.extract_strided_slice %10 {offsets = [0, 56], sizes = [16, 8], strides = [1, 1]} : vector<16x96xf32> to vector<16x8xf32>
    %72 = vector.extract_strided_slice %10 {offsets = [0, 88], sizes = [16, 8], strides = [1, 1]} : vector<16x96xf32> to vector<16x8xf32>
    %cst_33 = arith.constant dense<0.000000e+00> : vector<16x16xf32>
    %73 = tpu.matmul %70, %71, %cst_33 {dimension_numbers = #tpu.dot_dimension_numbers<[1], [1], [0], [0], [0, 0, 1, 0], [], []>} : vector<16x8xf32>, vector<16x8xf32>, vector<16x16xf32> -> vector<16x16xf32>
    %74 = arith.addf %73, %11 : vector<16x16xf32>
    %cst_34 = arith.constant dense<0xFF800000> : vector<16xf32>
    %75 = vector.multi_reduction <maximumf>, %74, %cst_34 [1] : vector<16x16xf32> to vector<16xf32>
    %76 = vector.shape_cast %75 : vector<16xf32> to vector<16x1xf32>
    %77 = vector.broadcast %76 : vector<16x1xf32> to vector<16x16xf32>
    %78 = arith.subf %74, %77 : vector<16x16xf32>
    %79 = math.exp %78 : vector<16x16xf32>
    %cst_35 = arith.constant dense<0.000000e+00> : vector<16xf32>
    %80 = vector.multi_reduction <add>, %79, %cst_35 [1] : vector<16x16xf32> to vector<16xf32>
    %81 = vector.shape_cast %80 : vector<16xf32> to vector<16x1xf32>
    %82 = vector.broadcast %81 : vector<16x1xf32> to vector<16x16xf32>
    %83 = arith.divf %79, %82 : vector<16x16xf32>
    %cst_36 = arith.constant dense<0.000000e+00> : vector<16x8xf32>
    %84 = tpu.matmul %83, %72, %cst_36 {dimension_numbers = #tpu.dot_dimension_numbers<[1], [0], [0], [1], [0, 0, 1, 1], [], []>} : vector<16x16xf32>, vector<16x8xf32>, vector<16x8xf32> -> vector<16x8xf32>
    %c0_37 = arith.constant 0 : index
    %c24 = arith.constant 24 : index
    %c0_38 = arith.constant 0 : index
    %85 = vector.load %arg7[%c0_37, %c24, %c0_38] : memref<1x32x32xf32, #tpu.memory_space<vmem>>, vector<1x8x32xf32>
    %86 = vector.shape_cast %85 : vector<1x8x32xf32> to vector<8x32xf32>
    %cst_39 = arith.constant dense<0.000000e+00> : vector<16x32xf32>
    %87 = tpu.matmul %84, %86, %cst_39 {dimension_numbers = #tpu.dot_dimension_numbers<[1], [0], [0], [1], [0, 0, 1, 1], [], []>} : vector<16x8xf32>, vector<8x32xf32>, vector<16x32xf32> -> vector<16x32xf32>
    %88 = arith.addf %69, %87 : vector<16x32xf32>
    %c0_40 = arith.constant 0 : index
    %c0_41 = arith.constant 0 : index
    %c0_42 = arith.constant 0 : index
    %89 = vector.load %arg8[%c0_40, %c0_41, %c0_42] : memref<1x1x32xf32, #tpu.memory_space<vmem>>, vector<1x1x32xf32>
    %90 = vector.shape_cast %89 : vector<1x1x32xf32> to vector<1x32xf32>
    %91 = vector.broadcast %90 : vector<1x32xf32> to vector<16x32xf32>
    %92 = arith.addf %88, %91 : vector<16x32xf32>
    %93 = arith.addf %92, %3 : vector<16x32xf32>
    %c0_43 = arith.constant 0 : index
    %c0_44 = arith.constant 0 : index
    %c0_45 = arith.constant 0 : index
    %94 = vector.load %arg9[%c0_43, %c0_44, %c0_45] : memref<1x1x32xf32, #tpu.memory_space<vmem>>, vector<1x1x32xf32>
    %95 = vector.shape_cast %94 : vector<1x1x32xf32> to vector<1x32xf32>
    %c0_46 = arith.constant 0 : index
    %c0_47 = arith.constant 0 : index
    %c0_48 = arith.constant 0 : index
    %96 = vector.load %arg10[%c0_46, %c0_47, %c0_48] : memref<1x1x32xf32, #tpu.memory_space<vmem>>, vector<1x1x32xf32>
    %97 = vector.shape_cast %96 : vector<1x1x32xf32> to vector<1x32xf32>
    %cst_49 = arith.constant dense<0.000000e+00> : vector<16xf32>
    %98 = vector.multi_reduction <add>, %93, %cst_49 [1] : vector<16x32xf32> to vector<16xf32>
    %99 = vector.shape_cast %98 : vector<16xf32> to vector<16x1xf32>
    %cst_50 = arith.constant 3.200000e+01 : f32
    %100 = vector.broadcast %cst_50 : f32 to vector<16x1xf32>
    %101 = arith.divf %99, %100 : vector<16x1xf32>
    %102 = vector.broadcast %101 : vector<16x1xf32> to vector<16x32xf32>
    %103 = arith.subf %93, %102 : vector<16x32xf32>
    %104 = arith.mulf %103, %103 : vector<16x32xf32>
    %cst_51 = arith.constant dense<0.000000e+00> : vector<16xf32>
    %105 = vector.multi_reduction <add>, %104, %cst_51 [1] : vector<16x32xf32> to vector<16xf32>
    %106 = vector.shape_cast %105 : vector<16xf32> to vector<16x1xf32>
    %cst_52 = arith.constant 3.200000e+01 : f32
    %107 = vector.broadcast %cst_52 : f32 to vector<16x1xf32>
    %108 = arith.divf %106, %107 : vector<16x1xf32>
    %cst_53 = arith.constant 9.99999996E-13 : f32
    %109 = vector.broadcast %cst_53 : f32 to vector<16x1xf32>
    %110 = arith.addf %108, %109 : vector<16x1xf32>
    %111 = math.rsqrt %110 : vector<16x1xf32>
    %112 = vector.broadcast %111 : vector<16x1xf32> to vector<16x32xf32>
    %113 = arith.mulf %103, %112 : vector<16x32xf32>
    %114 = vector.broadcast %95 : vector<1x32xf32> to vector<16x32xf32>
    %115 = arith.mulf %113, %114 : vector<16x32xf32>
    %116 = vector.broadcast %97 : vector<1x32xf32> to vector<16x32xf32>
    %117 = arith.addf %115, %116 : vector<16x32xf32>
    %c0_54 = arith.constant 0 : index
    %c0_55 = arith.constant 0 : index
    %c0_56 = arith.constant 0 : index
    %118 = vector.load %arg11[%c0_54, %c0_55, %c0_56] : memref<1x32x64xf32, #tpu.memory_space<vmem>>, vector<1x32x64xf32>
    %119 = vector.shape_cast %118 : vector<1x32x64xf32> to vector<32x64xf32>
    %cst_57 = arith.constant dense<0.000000e+00> : vector<16x64xf32>
    %120 = tpu.matmul %117, %119, %cst_57 {dimension_numbers = #tpu.dot_dimension_numbers<[1], [0], [0], [1], [0, 0, 1, 1], [], []>} : vector<16x32xf32>, vector<32x64xf32>, vector<16x64xf32> -> vector<16x64xf32>
    %c0_58 = arith.constant 0 : index
    %c0_59 = arith.constant 0 : index
    %c0_60 = arith.constant 0 : index
    %121 = vector.load %arg12[%c0_58, %c0_59, %c0_60] : memref<1x1x64xf32, #tpu.memory_space<vmem>>, vector<1x1x64xf32>
    %122 = vector.shape_cast %121 : vector<1x1x64xf32> to vector<1x64xf32>
    %123 = vector.broadcast %122 : vector<1x64xf32> to vector<16x64xf32>
    %124 = arith.addf %120, %123 : vector<16x64xf32>
    %cst_61 = arith.constant 5.000000e-01 : f32
    %125 = vector.broadcast %cst_61 : f32 to vector<16x64xf32>
    %126 = arith.mulf %125, %124 : vector<16x64xf32>
    %cst_62 = arith.constant 4.471500e-02 : f32
    %127 = vector.broadcast %cst_62 : f32 to vector<16x64xf32>
    %128 = arith.mulf %127, %124 : vector<16x64xf32>
    %129 = arith.mulf %128, %124 : vector<16x64xf32>
    %130 = arith.mulf %129, %124 : vector<16x64xf32>
    %131 = arith.addf %124, %130 : vector<16x64xf32>
    %cst_63 = arith.constant 0.797884583 : f32
    %132 = vector.broadcast %cst_63 : f32 to vector<16x64xf32>
    %133 = arith.mulf %132, %131 : vector<16x64xf32>
    %134 = math.tanh %133 : vector<16x64xf32>
    %cst_64 = arith.constant 1.000000e+00 : f32
    %135 = vector.broadcast %cst_64 : f32 to vector<16x64xf32>
    %136 = arith.addf %135, %134 : vector<16x64xf32>
    %137 = arith.mulf %126, %136 : vector<16x64xf32>
    %c0_65 = arith.constant 0 : index
    %c0_66 = arith.constant 0 : index
    %c0_67 = arith.constant 0 : index
    %138 = vector.load %arg13[%c0_65, %c0_66, %c0_67] : memref<1x64x32xf32, #tpu.memory_space<vmem>>, vector<1x64x32xf32>
    %139 = vector.shape_cast %138 : vector<1x64x32xf32> to vector<64x32xf32>
    %cst_68 = arith.constant dense<0.000000e+00> : vector<16x32xf32>
    %140 = tpu.matmul %137, %139, %cst_68 {dimension_numbers = #tpu.dot_dimension_numbers<[1], [0], [0], [1], [0, 0, 1, 1], [], []>} : vector<16x64xf32>, vector<64x32xf32>, vector<16x32xf32> -> vector<16x32xf32>
    %c0_69 = arith.constant 0 : index
    %c0_70 = arith.constant 0 : index
    %c0_71 = arith.constant 0 : index
    %141 = vector.load %arg14[%c0_69, %c0_70, %c0_71] : memref<1x1x32xf32, #tpu.memory_space<vmem>>, vector<1x1x32xf32>
    %142 = vector.shape_cast %141 : vector<1x1x32xf32> to vector<1x32xf32>
    %143 = vector.broadcast %142 : vector<1x32xf32> to vector<16x32xf32>
    %144 = arith.addf %140, %143 : vector<16x32xf32>
    %145 = arith.addf %144, %117 : vector<16x32xf32>
    %c0_72 = arith.constant 0 : index
    %c0_73 = arith.constant 0 : index
    %c0_74 = arith.constant 0 : index
    %146 = vector.load %arg15[%c0_72, %c0_73, %c0_74] : memref<1x1x32xf32, #tpu.memory_space<vmem>>, vector<1x1x32xf32>
    %147 = vector.shape_cast %146 : vector<1x1x32xf32> to vector<1x32xf32>
    %c0_75 = arith.constant 0 : index
    %c0_76 = arith.constant 0 : index
    %c0_77 = arith.constant 0 : index
    %148 = vector.load %arg16[%c0_75, %c0_76, %c0_77] : memref<1x1x32xf32, #tpu.memory_space<vmem>>, vector<1x1x32xf32>
    %149 = vector.shape_cast %148 : vector<1x1x32xf32> to vector<1x32xf32>
    %cst_78 = arith.constant dense<0.000000e+00> : vector<16xf32>
    %150 = vector.multi_reduction <add>, %145, %cst_78 [1] : vector<16x32xf32> to vector<16xf32>
    %151 = vector.shape_cast %150 : vector<16xf32> to vector<16x1xf32>
    %cst_79 = arith.constant 3.200000e+01 : f32
    %152 = vector.broadcast %cst_79 : f32 to vector<16x1xf32>
    %153 = arith.divf %151, %152 : vector<16x1xf32>
    %154 = vector.broadcast %153 : vector<16x1xf32> to vector<16x32xf32>
    %155 = arith.subf %145, %154 : vector<16x32xf32>
    %156 = arith.mulf %155, %155 : vector<16x32xf32>
    %cst_80 = arith.constant dense<0.000000e+00> : vector<16xf32>
    %157 = vector.multi_reduction <add>, %156, %cst_80 [1] : vector<16x32xf32> to vector<16xf32>
    %158 = vector.shape_cast %157 : vector<16xf32> to vector<16x1xf32>
    %cst_81 = arith.constant 3.200000e+01 : f32
    %159 = vector.broadcast %cst_81 : f32 to vector<16x1xf32>
    %160 = arith.divf %158, %159 : vector<16x1xf32>
    %cst_82 = arith.constant 9.99999996E-13 : f32
    %161 = vector.broadcast %cst_82 : f32 to vector<16x1xf32>
    %162 = arith.addf %160, %161 : vector<16x1xf32>
    %163 = math.rsqrt %162 : vector<16x1xf32>
    %164 = vector.broadcast %163 : vector<16x1xf32> to vector<16x32xf32>
    %165 = arith.mulf %155, %164 : vector<16x32xf32>
    %166 = vector.broadcast %147 : vector<1x32xf32> to vector<16x32xf32>
    %167 = arith.mulf %165, %166 : vector<16x32xf32>
    %168 = vector.broadcast %149 : vector<1x32xf32> to vector<16x32xf32>
    %169 = arith.addf %167, %168 : vector<16x32xf32>
    %c0_83 = arith.constant 0 : index
    %c0_84 = arith.constant 0 : index
    %170 = vector.load %arg22[%c0_83, %c0_84] : memref<16x32xf32, #tpu.memory_space<vmem>>, vector<16x32xf32>
    tpu.vector_store %arg22[%c0_83, %c0_84], %169 {strides = array<i32>} : memref<16x32xf32, #tpu.memory_space<vmem>>, vector<16x32xf32>,
    %c1_i32 = arith.constant 1 : i32
    %171 = arith.cmpi eq, %arg0, %c1_i32 : i32
    %172 = arith.extui %171 : i1 to i32
    %c0_i32_85 = arith.constant 0 : i32
    %173 = arith.cmpi ne, %172, %c0_i32_85 : i32
    scf.if %173 {
      %174 = vector.extract_strided_slice %169 {offsets = [0, 0], sizes = [1, 32], strides = [1, 1]} : vector<16x32xf32> to vector<1x32xf32>
      %175 = vector.extract_strided_slice %169 {offsets = [8, 0], sizes = [1, 32], strides = [1, 1]} : vector<16x32xf32> to vector<1x32xf32>
      %176 = tpu.concatenate %174, %175 in 0 : vector<1x32xf32>, vector<1x32xf32> -> vector<2x32xf32>
      %c0_86 = arith.constant 0 : index
      %c0_87 = arith.constant 0 : index
      %177 = vector.load %arg17[%c0_86, %c0_87] : memref<32x32xf32, #tpu.memory_space<vmem>>, vector<32x32xf32>
      %cst_88 = arith.constant dense<0.000000e+00> : vector<2x32xf32>
      %178 = tpu.matmul %176, %177, %cst_88 {dimension_numbers = #tpu.dot_dimension_numbers<[1], [0], [0], [1], [0, 0, 1, 1], [], []>} : vector<2x32xf32>, vector<32x32xf32>, vector<2x32xf32> -> vector<2x32xf32>
      %c0_89 = arith.constant 0 : index
      %c0_90 = arith.constant 0 : index
      %179 = vector.load %arg18[%c0_89, %c0_90] : memref<1x32xf32, #tpu.memory_space<vmem>>, vector<1x32xf32>
      %180 = vector.broadcast %179 : vector<1x32xf32> to vector<2x32xf32>
      %181 = arith.addf %178, %180 : vector<2x32xf32>
      %182 = math.tanh %181 : vector<2x32xf32>
      %c0_91 = arith.constant 0 : index
      %c0_92 = arith.constant 0 : index
      %183 = vector.load %arg19[%c0_91, %c0_92] : memref<32x3xf32, #tpu.memory_space<vmem>>, vector<32x3xf32>
      %cst_93 = arith.constant dense<0.000000e+00> : vector<2x3xf32>
      %184 = tpu.matmul %182, %183, %cst_93 {dimension_numbers = #tpu.dot_dimension_numbers<[1], [0], [0], [1], [0, 0, 1, 1], [], []>} : vector<2x32xf32>, vector<32x3xf32>, vector<2x3xf32> -> vector<2x3xf32>
      %c0_94 = arith.constant 0 : index
      %c0_95 = arith.constant 0 : index
      %185 = vector.load %arg20[%c0_94, %c0_95] : memref<1x3xf32, #tpu.memory_space<vmem>>, vector<1x3xf32>
      %186 = vector.broadcast %185 : vector<1x3xf32> to vector<2x3xf32>
      %187 = arith.addf %184, %186 : vector<2x3xf32>
      %c0_96 = arith.constant 0 : index
      %c0_97 = arith.constant 0 : index
      %188 = vector.load %arg21[%c0_96, %c0_97] : memref<2x3xf32, #tpu.memory_space<vmem>>, vector<2x3xf32>
      tpu.vector_store %arg21[%c0_96, %c0_97], %187 {strides = array<i32>} : memref<2x3xf32, #tpu.memory_space<vmem>>, vector<2x3xf32>,
    } else {
    }
    return
  }
  func.func @transform_0(%arg0: i32) -> (i32, i32) {
    %c0_i32 = arith.constant 0 : i32
    %c0_i32_0 = arith.constant 0 : i32
    %c0_i32_1 = arith.constant 0 : i32
    return %c0_i32, %c0_i32_0 : i32, i32
  }
  func.func @transform_1(%arg0: i32) -> (i32, i32) {
    %c0_i32 = arith.constant 0 : i32
    %c0_i32_0 = arith.constant 0 : i32
    %c0_i32_1 = arith.constant 0 : i32
    return %c0_i32, %c0_i32_0 : i32, i32
  }
  func.func @transform_2(%arg0: i32) -> (i32, i32) {
    %c0_i32 = arith.constant 0 : i32
    %c0_i32_0 = arith.constant 0 : i32
    %c0_i32_1 = arith.constant 0 : i32
    return %c0_i32, %c0_i32_0 : i32, i32
  }
  func.func @transform_3(%arg0: i32) -> (i32, i32) {
    %c0_i32 = arith.constant 0 : i32
    %c0_i32_0 = arith.constant 0 : i32
    %c0_i32_1 = arith.constant 0 : i32
    return %c0_i32, %c0_i32_0 : i32, i32
  }
  func.func @transform_4(%arg0: i32) -> (i32, i32, i32) {
    %c0_i32 = arith.constant 0 : i32
    %c0_i32_0 = arith.constant 0 : i32
    %c0_i32_1 = arith.constant 0 : i32
    return %arg0, %c0_i32, %c0_i32_0 : i32, i32, i32
  }
  func.func @transform_5(%arg0: i32) -> (i32, i32, i32) {
    %c0_i32 = arith.constant 0 : i32
    %c0_i32_0 = arith.constant 0 : i32
    %c0_i32_1 = arith.constant 0 : i32
    return %arg0, %c0_i32, %c0_i32_0 : i32, i32, i32
  }
  func.func @transform_6(%arg0: i32) -> (i32, i32, i32) {
    %c0_i32 = arith.constant 0 : i32
    %c0_i32_0 = arith.constant 0 : i32
    %c0_i32_1 = arith.constant 0 : i32
    return %arg0, %c0_i32, %c0_i32_0 : i32, i32, i32
  }
  func.func @transform_7(%arg0: i32) -> (i32, i32, i32) {
    %c0_i32 = arith.constant 0 : i32
    %c0_i32_0 = arith.constant 0 : i32
    %c0_i32_1 = arith.constant 0 : i32
    return %arg0, %c0_i32, %c0_i32_0 : i32, i32, i32
  }
  func.func @transform_8(%arg0: i32) -> (i32, i32, i32) {
    %c0_i32 = arith.constant 0 : i32
    %c0_i32_0 = arith.constant 0 : i32
    %c0_i32_1 = arith.constant 0 : i32
    return %arg0, %c0_i32, %c0_i32_0 : i32, i32, i32
  }
  func.func @transform_9(%arg0: i32) -> (i32, i32, i32) {
    %c0_i32 = arith.constant 0 : i32
    %c0_i32_0 = arith.constant 0 : i32
    %c0_i32_1 = arith.constant 0 : i32
    return %arg0, %c0_i32, %c0_i32_0 : i32, i32, i32
  }
  func.func @transform_10(%arg0: i32) -> (i32, i32, i32) {
    %c0_i32 = arith.constant 0 : i32
    %c0_i32_0 = arith.constant 0 : i32
    %c0_i32_1 = arith.constant 0 : i32
    return %arg0, %c0_i32, %c0_i32_0 : i32, i32, i32
  }
  func.func @transform_11(%arg0: i32) -> (i32, i32, i32) {
    %c0_i32 = arith.constant 0 : i32
    %c0_i32_0 = arith.constant 0 : i32
    %c0_i32_1 = arith.constant 0 : i32
    return %arg0, %c0_i32, %c0_i32_0 : i32, i32, i32
  }
  func.func @transform_12(%arg0: i32) -> (i32, i32, i32) {
    %c0_i32 = arith.constant 0 : i32
    %c0_i32_0 = arith.constant 0 : i32
    %c0_i32_1 = arith.constant 0 : i32
    return %arg0, %c0_i32, %c0_i32_0 : i32, i32, i32
  }
  func.func @transform_13(%arg0: i32) -> (i32, i32, i32) {
    %c0_i32 = arith.constant 0 : i32
    %c0_i32_0 = arith.constant 0 : i32
    %c0_i32_1 = arith.constant 0 : i32
    return %arg0, %c0_i32, %c0_i32_0 : i32, i32, i32
  }
  func.func @transform_14(%arg0: i32) -> (i32, i32, i32) {
    %c0_i32 = arith.constant 0 : i32
    %c0_i32_0 = arith.constant 0 : i32
    %c0_i32_1 = arith.constant 0 : i32
    return %arg0, %c0_i32, %c0_i32_0 : i32, i32, i32
  }
  func.func @transform_15(%arg0: i32) -> (i32, i32, i32) {
    %c0_i32 = arith.constant 0 : i32
    %c0_i32_0 = arith.constant 0 : i32
    %c0_i32_1 = arith.constant 0 : i32
    return %arg0, %c0_i32, %c0_i32_0 : i32, i32, i32
  }
  func.func @transform_16(%arg0: i32) -> (i32, i32) {
    %c0_i32 = arith.constant 0 : i32
    %c0_i32_0 = arith.constant 0 : i32
    %c0_i32_1 = arith.constant 0 : i32
    return %c0_i32, %c0_i32_0 : i32, i32
  }
  func.func @transform_17(%arg0: i32) -> (i32, i32) {
    %c0_i32 = arith.constant 0 : i32
    %c0_i32_0 = arith.constant 0 : i32
    %c0_i32_1 = arith.constant 0 : i32
    return %c0_i32, %c0_i32_0 : i32, i32
  }
  func.func @transform_18(%arg0: i32) -> (i32, i32) {
    %c0_i32 = arith.constant 0 : i32
    %c0_i32_0 = arith.constant 0 : i32
    %c0_i32_1 = arith.constant 0 : i32
    return %c0_i32, %c0_i32_0 : i32, i32
  }
  func.func @transform_19(%arg0: i32) -> (i32, i32) {
    %c0_i32 = arith.constant 0 : i32
    %c0_i32_0 = arith.constant 0 : i32
    %c0_i32_1 = arith.constant 0 : i32
    return %c0_i32, %c0_i32_0 : i32, i32
  }
  func.func @transform_20(%arg0: i32) -> (i32, i32) {
    %c0_i32 = arith.constant 0 : i32
    %c0_i32_0 = arith.constant 0 : i32
    %c0_i32_1 = arith.constant 0 : i32
    return %c0_i32, %c0_i32_0 : i32, i32
  }
}

</mosaic_0001>

<bundles_post_ra>
// kernel: bert_classifier_forward.1
= control target key start
LH: loop header
LB: loop body
LE: loop exit
PB: predicated region body
PF: predicated region fallthrough
CT: control target
= control target key end

     0   :  { %s3708_s0 = inlined_call_operand.vmem [shape: f32[16,32], index: 0, kind: input, shape index: {}]   ;;  %s3709_s1 = inlined_call_operand.vmem [shape: f32[16,16], index: 1, kind: input, shape index: {}]   ;;  %s3710_s2 = inlined_call_operand.vmem [shape: f32[1,32], index: 2, kind: input, shape index: {}]   ;;  %s3711_s3 = inlined_call_operand.vmem [shape: f32[1,32], index: 3, kind: input, shape index: {}]   ;;  %s3712_s4 = inlined_call_operand.vmem [shape: f32[2,32,96], index: 4, kind: input, shape index: {}]   ;;  %s3713_s5 = inlined_call_operand.vmem [shape: f32[2,1,96], index: 5, kind: input, shape index: {}]   ;;  %s3714_s6 = inlined_call_operand.vmem [shape: f32[2,32,32], index: 6, kind: input, shape index: {}]   ;;  %s3715_s7 = inlined_call_operand.vmem [shape: f32[2,1,32], index: 7, kind: input, shape index: {}]   ;;  %s3716_s8 = inlined_call_operand.vmem [shape: f32[2,1,32], index: 8, kind: input, shape index: {}]   ;;  %s3717_s9 = inlined_call_operand.vmem [shape: f32[2,1,32], index: 9, kind: input, shape index: {}]   ;;  %s3718_s10 = inlined_call_operand.vmem [shape: f32[2,32,64], index: 10, kind: input, shape index: {}]   ;;  %s3719_s11 = inlined_call_operand.vmem [shape: f32[2,1,64], index: 11, kind: input, shape index: {}]   ;;  %s3720_s12 = inlined_call_operand.vmem [shape: f32[2,64,32], index: 12, kind: input, shape index: {}]   ;;  %s3721_s13 = inlined_call_operand.vmem [shape: f32[2,1,32], index: 13, kind: input, shape index: {}]   ;;  %s3722_s14 = inlined_call_operand.vmem [shape: f32[2,1,32], index: 14, kind: input, shape index: {}]   ;;  %s3723_s15 = inlined_call_operand.vmem [shape: f32[2,1,32], index: 15, kind: input, shape index: {}]   ;;  %s3724_s16 = inlined_call_operand.vmem [shape: f32[32,32], index: 16, kind: input, shape index: {}]   ;;  %s3725_s17 = inlined_call_operand.vmem [shape: f32[1,32], index: 17, kind: input, shape index: {}]   ;;  %s3726_s18 = inlined_call_operand.vmem [shape: f32[32,3], index: 18, kind: input, shape index: {}]   ;;  %s3727_s19 = inlined_call_operand.vmem [shape: f32[1,3], index: 19, kind: input, shape index: {}]   ;;  %s3728_s20 = inlined_call_operand.hbm [shape: f32[2,3], index: 20, kind: output, shape index: {}]  }
   0x1   :  { %3735 = sst [smem:[#allocation7_spill]] %s3708_s0 }
   0x2   :  { %3736 = sst [smem:[#allocation8_spill]] %s3709_s1 }
   0x3   :  { %3737 = sst [smem:[#allocation9_spill]] %s3710_s2 }
   0x4   :  { %3738 = sst [smem:[#allocation10_spill]] %s3711_s3 }
   0x5   :  { %3739 = sst [smem:[#allocation11_spill]] %s3712_s4 }
   0x6   :  { %3740 = sst [smem:[#allocation12_spill]] %s3714_s6 }
   0x7   :  { %3741 = sst [smem:[#allocation13_spill]] %s3724_s16 }
   0x8   :  { %3742 = sst [smem:[#allocation14_spill]] %s3725_s17 }
   0x9   :  { %3743 = sst [smem:[#allocation15_spill]] %s3726_s18 }
   0xa   :  { %3744 = sst [smem:[#allocation16_spill]] %s3727_s19 }
   0xb   :  { %3745 = sst [smem:[#allocation17_spill]] %s3728_s20 }
   0xc   :  { %25 = vsyncpa [#allocation4], 0  ;;  %s3372_s1 = smov 0  }
   0xd LB: > { %3746 = sst [smem:[#allocation6_spill]] %s3250_s1  ;;  %s3378_s22 = sadd.s32 4294967295, %s3250_s1   ;;  %s3250_s1 = sphi %s3372_s1, %s31_s1  }
   0xe   : > { %p2719_p0 = scmp.ge.s32.totalorder %s3250_s1, 1  ;;  %p652_p1 = scmp.lt.s32.totalorder %s3250_s1, 3 }
  0x10   : > { %p653_p2 = pnand %p2719_p0, %p652_p1 }
  0x11   : > { %p744_p3 = scmp.lt.s32.totalorder (!%p653_p2), %s3378_s22, 1  ;;  %s3747_s28 = sld [smem:[#allocation11_spill]] (!%p653_p2) }
  0x12   : > { %656 = sbr.rel (%p653_p2) target bundleno = 3779 (0xec3), region = 100  ;;  %s3748_s6 = sld [smem:[#allocation12_spill]] (!%p653_p2) }
  0x13   : > { %p2728_p4 = scmp.ne.s32.totalorder (!%p653_p2), %s3378_s22, 0 }
  0x19   : > { %s3384_s23 = scalar_select %p744_p3, %s3378_s22, 1 }
  0x1a   : > { %791 = sbr.rel (%p2728_p4) target bundleno = 351 (0x15f), region = 104  ;;  %s3749_s1 = sld [smem:[#allocation7_spill]] (!%p2728_p4)  ;;  %vm796_vm0 = vcmask (!%p2728_p4), 261120  }
  0x1b   : > { %s2786_s24 = sshll.u32 %s3384_s23, 5  ;;  %s2789_s16 = sshll.u32 %s3384_s23, 6 }
  0x1c   : > { %s3394_s4 = scalar_lea.vmem %s3747_s28, %s2786_s24  ;;  %s3399_s0 = scalar_lea.vmem %s3748_s6, %s2786_s24 }
  0x1d   : > { %s3416_s28 = scalar_lea.vmem %s3718_s10, %s2786_s24  ;;  %s3426_s20 = scalar_lea.vmem %s3720_s12, %s2789_s16 }
  0x1e   : > { %s781_s2 = scalar_lea.vmem %s3721_s13, %s3384_s23  ;;  %s784_s26 = scalar_lea.vmem %s3722_s14, %s3384_s23 }
  0x1f   : > { %s787_s18 = scalar_lea.vmem %s3723_s15, %s3384_s23  ;;  %s3751_s17 = sld [smem:[#allocation9_spill]] (!%p2728_p4) }
  0x20   : > { %s3750_s21 = smov (!%p2728_p4), %s3749_s1  ;;  %v792_v0 = vld [vmem:[%s3749_s1] sm:$0xff] (!%p2728_p4)  ;;  %s3752_s24 = sld [smem:[#allocation10_spill]] (!%p2728_p4) }
  0x21   : > { %v793_v1 = vld [vmem:[%s3750_s21 + $0x8] sm:$0xff]  ;;  %v797_v2 = vsel %vm796_vm0, %v792_v0, 0.0 }
  0x22   : > { %798 = vadd.xlane.f32.xlu0 %v797_v2  ;;  %v800_v3 = vsel %vm796_vm0, %v793_v1, 0.0 }
  0x25   : > { %v2729_v21 = vld [vmem:[%s3751_s17] ss:$0 sm:$0xff] }
  0x26   : > { %801 = vadd.xlane.f32.xlu0 %v800_v3  ;;  %v2730_v23 = vld [vmem:[%s3752_s24] ss:$0 sm:$0xff] }
  0xaf   : > { %v799_v4 = vpop.xlane.xlu0 %798 }
  0xb0   : > { %v804_v5 = vmul.f32 0.03125, %v799_v4 }
  0xb2   : > { %v806_v6 = vsub.f32 %v792_v0, %v804_v5 }
  0xb3   : > { %v802_v7 = vpop.xlane.xlu0 %801 }
  0xb4   : > { %v805_v8 = vmul.f32 0.03125, %v802_v7  ;;  %v808_v9 = vmul.f32 %v806_v6, %v806_v6 }
  0xb6   : > { %v807_v10 = vsub.f32 %v793_v1, %v805_v8  ;;  %v810_v11 = vsel %vm796_vm0, %v808_v9, 0.0 }
  0xb7   : > { %811 = vadd.xlane.f32.xlu1 %v810_v11 }
  0xb8   : > { %v809_v12 = vmul.f32 %v807_v10, %v807_v10 }
  0xba   : > { %v813_v13 = vsel %vm796_vm0, %v809_v12, 0.0 }
  0xbb   : > { %814 = vadd.xlane.f32.xlu1 %v813_v13 }
 0x144   : > { %v812_v14 = vpop.xlane.xlu1 %811 }
 0x145   : > { %v816_v15 = vmul.f32 0.03125, %v812_v14 }
 0x147   : > { %v818_v16 = vadd.f32 1e-12, %v816_v15 }
 0x148   : > { %v815_v17 = vpop.xlane.xlu1 %814 }
 0x149   : > { %3124 = vrsqrt.f32 %v818_v16  ;;  %v817_v18 = vmul.f32 0.03125, %v815_v17 }
 0x14b   : > { %v819_v19 = vadd.f32 1e-12, %v817_v18 }
 0x14d   : > { %3126 = vrsqrt.f32 %v819_v19 }
 0x153   : > { %v3125_v20 = vpop.eup %3124 }
 0x154   : > { %v822_v22 = vmul.f32 %v3125_v20, %v806_v6 }
 0x156   : > { %v830_v24 = vmul.f32 %v2729_v21, %v822_v22 }
 0x157   : > { %v3127_v25 = vpop.eup %3126 }
 0x158   : > { %v838_v26 = vadd.f32 %v2730_v23, %v830_v24  ;;  %v823_v27 = vmul.f32 %v3127_v25, %v807_v10 }
 0x15a   : > { %840 = vst.msk [vmem:[#allocation2] sm:$0xff] %vm796_vm0, %v838_v26  ;;  %v831_v28 = vmul.f32 %v2729_v21, %v823_v27 }
 0x15c   : > { %v839_v29 = vadd.f32 %v2730_v23, %v831_v28 }
 0x15e   : > { %841 = vst.msk [vmem:[#allocation2 + $0x8] sm:$0xff] %vm796_vm0, %v839_v29 }
 0x15f PF: > { %v844_v30 = vld [vmem:[%s3394_s4] sm:$0xff]  ;;  %v845_v31 = vld [vmem:[%s3394_s4 + $0x8] sm:$0xff]  ;;  %v846_v32 = vld [vmem:[%s3394_s4 + $0x10] sm:$0xff]  ;;  %vm855_vm1 = vcmask 261120   ;;  %s3753_s30 = scalar_lea.vmem %s3713_s5, %s3384_s23  ;;  %vm945_vm2 = vcmask 64512   ;;  %s3253_s1 = smov 96  }
 0x160   : > { %v3005_v33 = vpack.c.bf16 %v845_v31, %v844_v30  ;;  %v847_v34 = vld [vmem:[%s3394_s4 + $0x18] sm:$0xff]  ;;  %v2731_v38 = vld [vmem:[%s3753_s30] ss:$0 sm:$0xff]  ;;  %s3252_s4 = smov 120   ;;  %s3254_s16 = smov 88   ;;  %vm3495_vm3 = vmpackc.low %vm945_vm2, %vm945_vm2  ;;  %vm1029_vm4 = vcmask 130048  }
 0x161   : > { %v3463_v35 = vld [vmem:[#allocation2] sm:$0xff]  ;;  %v3009_v36 = vpack.c.bf16 %v847_v34, %v846_v32  ;;  %s3255_s6 = smov 112   ;;  %s3256_s3 = smov 80   ;;  %vm2252_vm5 = vcmask 523264  }
 0x162   : > { %2874 = vmatprep.mubr.msk.f32.mxu1 %vm855_vm1, %v3463_v35  ;;  %3006 = vmatprep.subr.bf16.mxu1 %v3005_v33  ;;  %s3756_s25 = sld [smem:[#allocation8_spill]]  ;;  %s3257_s29 = smov 56  }
 0x163   : > { %3008 = vmatpush3.bf16.msra.mxu1 %v3005_v33  ;;  %s3258_s30 = smov 72   ;;  %s3757_s17 = scalar_lea.vmem %s3715_s7, %s3384_s23 }
 0x164   : > { %3010 = vmatprep.subr.bf16.mxu1 %v3009_v36  ;;  %p2777_p5 = scmp.ne.s32.totalorder %s3378_s22, 1 }
 0x165   : > { %v3467_v37 = vld [vmem:[#allocation2 + $0x8] sm:$0xff]  ;;  %s3761_s24 = sld [smem:[#allocation13_spill]] (!%p2777_p5)  ;;  %vm3264_vm6 = vmmov (!%p2777_p5), 0   ;;  %vm2389_vm7 = vcmask (!%p2777_p5), 1040384   ;;  %s3764_s27 = sld [smem:[#allocation16_spill]] (!%p2777_p5)  ;;  %vm2560_vm8 = vcmask (!%p2777_p5), 17408  }
 0x167   : > { %3012 = vmatpush3.bf16.msra.mxu1 %v3009_v36 }
 0x168   : > { %v3520_v61 = vld [vmem:[%s3756_s25 + $0x8] sm:$0xff]  ;;  %v3525_v62 = vld [vmem:[%s3756_s25] sm:$0xff] }
 0x16a   : > { %2875 = vmatmul.mubr.msk.f32.vlgmr.msra.gmra.mrb[0].mxu1 %vm855_vm1, %v3467_v37 }
 0x23d   : > { %v2876_v39 = vpop.f32.mrb[0].mxu1 }
 0x23e   : > { %v3476_v40 = vadd.f32 %v2876_v39, %v2731_v38  ;;  %v928_v41 = vpop.f32.mrb[1].mxu1 }
 0x23f   : > { %v3478_v42 = vadd.f32 %v2731_v38, %v928_v41 }
 0x241   : > { %1140 = vrot.lane.b32.xlu1 %v3478_v42, %s3252_s4  ;;  %2881 = vmatprep.mubr.msk.f32.mxu1 %vm945_vm2, %v3478_v42  ;;  %v3485_v43 = vpack.i.bf16 %v3476_v40, %v3478_v42 }
 0x243   : > { %3129 = vrot.lane.b32.xlu0 %v3485_v43, %s3253_s1  ;;  %s3260_s1 = smov 104  }
 0x245   : > { %1142 = vrot.lane.b32.xlu1 %v3476_v40, %s3252_s4  ;;  %s3259_s4 = smov 64  }
 0x247   : > { %3134 = vrot.lane.b32.xlu0 %v3485_v43, %s3254_s16  ;;  %s3261_s16 = smov 48  }
 0x249   : > { %1503 = vrot.lane.b32.xlu1 %v3478_v42, %s3255_s6 }
 0x24b   : > { %3139 = vrot.lane.b32.xlu0 %v3485_v43, %s3256_s3 }
 0x24f   : > { %1505 = vrot.lane.b32.xlu0 %v3476_v40, %s3255_s6  ;;  %s3262_s6 = smov 40  }
 0x2b3   : > { %v1141_v54 = vpop.permute.xlu1 %1140 }
 0x2b5   : > { %v3130_v44 = vpop.permute.xlu0 %3129 }
 0x2b6   : > { %v3132_v45 = vunpack.i.h.bf16 %v3130_v44  ;;  %v3131_v46 = vunpack.i.l.bf16 %v3130_v44 }
 0x2b7   : > { %v1143_v58 = vpop.permute.xlu1 %1142 }
 0x2b8   : > { %v3013_v48 = vpack.c.bf16 %v3132_v45, %v3131_v46 }
 0x2b9   : > { %v3135_v49 = vpop.permute.xlu0 %3134 }
 0x2ba   : > { %v3137_v50 = vunpack.i.h.bf16 %v3135_v49  ;;  %v3136_v51 = vunpack.i.l.bf16 %v3135_v49  ;;  %3015 = vmatprep.subr.msk.bf16.mxu1 %vm3495_vm3, %v3013_v48 }
 0x2bb   : > { %3018 = vmatpush3.bf16.xpose.msk.msra.mxu1 %vm3495_vm3, %v3013_v48  ;;  %v1504_v59 = vpop.permute.xlu1 %1503 }
 0x2bc   : > { %v3023_v52 = vpack.c.bf16 %v3137_v50, %v3136_v51 }
 0x2bd   : > { %v3140_v53 = vpop.permute.xlu0 %3139 }
 0x2be   : > { %v3142_v55 = vunpack.i.h.bf16 %v3140_v53  ;;  %v3141_v56 = vunpack.i.l.bf16 %v3140_v53  ;;  %3025 = vmatprep.subr.msk.bf16.mxu1 %vm3495_vm3, %v3023_v52 }
 0x2c0   : > { %v3033_v57 = vpack.c.bf16 %v3142_v55, %v3141_v56 }
 0x2c1   : > { %v1506_v60 = vpop.permute.xlu0 %1505 }
 0x2c2   : > { %2882 = vmatmul.mubr.msk.f32.vlgmr.msra.gmra.mrb[2].mxu1 %vm945_vm2, %v3476_v40 }
 0x2c3   : > { %3028 = vmatpush3.bf16.xpose.msk.msra.mxu1 %vm3495_vm3, %v3023_v52  ;;  %2895 = vmatprep.mubr.msk.f32.mxu1 %vm945_vm2, %v1141_v54 }
 0x2c4   : > { %3035 = vmatprep.subr.msk.bf16.mxu1 %vm3495_vm3, %v3033_v57 }
 0x2ca   : > { %2896 = vmatmul.mubr.msk.f32.vlgmr.msra.gmra.mrb[4].mxu1 %vm945_vm2, %v1143_v58 }
 0x2cb   : > { %3038 = vmatpush3.bf16.xpose.msk.msra.mxu1 %vm3495_vm3, %v3033_v57  ;;  %2919 = vmatprep.mubr.msk.f32.mxu1 %vm945_vm2, %v1504_v59 }
 0x2d2   : > { %2920 = vmatmul.mubr.msk.f32.vlgmr.msra.gmra.mrb[6].mxu1 %vm945_vm2, %v1506_v60 }
 0x395   : > { %v2883_v63 = vpop.f32.mrb[2].mxu1 }
 0x396   : > { %v1026_v0 = vadd.f32 %v2883_v63, %v3520_v61  ;;  %v1020_v1 = vpop.f32.mrb[3].mxu1 }
 0x397   : > { %v1021_v2 = vadd.f32 %v1020_v1, %v3525_v62 }
 0x398   : > { %v1033_v3 = vsel %vm1029_vm4, %v1026_v0, -inf }
 0x399   : > { %1034 = vmax.xlane.f32.xlu0 %v1033_v3  ;;  %v1030_v4 = vsel %vm1029_vm4, %v1021_v2, -inf }
 0x39a   : > { %1031 = vmax.xlane.f32.xlu1 %v1030_v4 }
 0x39d   : > { %v2897_v5 = vpop.f32.mrb[4].mxu1 }
 0x39e   : > { %v1228_v6 = vadd.f32 %v2897_v5, %v3520_v61  ;;  %v1222_v7 = vpop.f32.mrb[5].mxu1 }
 0x39f   : > { %v1223_v8 = vadd.f32 %v1222_v7, %v3525_v62 }
 0x3a0   : > { %v1234_v9 = vsel %vm1029_vm4, %v1228_v6, -inf }
 0x3a1   : > { %1235 = vmax.xlane.f32.xlu1 %v1234_v9  ;;  %v1231_v10 = vsel %vm1029_vm4, %v1223_v8, -inf }
 0x3a2   : > { %1232 = vmax.xlane.f32.xlu0 %v1231_v10 }
 0x3a5   : > { %v2921_v11 = vpop.f32.mrb[6].mxu1 }
 0x3a6   : > { %v1585_v12 = vpop.f32.mrb[7].mxu1  ;;  %v1591_v34 = vadd.f32 %v2921_v11, %v3520_v61 }
 0x3a7   : > { %v1586_v33 = vadd.f32 %v1585_v12, %v3525_v62 }
 0x3a8   : > { %v1597_v38 = vsel %vm1029_vm4, %v1591_v34, -inf }
 0x3a9   : > { %v1594_v36 = vsel %vm1029_vm4, %v1586_v33, -inf }
 0x426   : > { %v1035_v13 = vpop.xlane.xlu0 %1034 }
 0x427   : > { %v1037_v14 = vsub.f32 %v1026_v0, %v1035_v13  ;;  %v1032_v15 = vpop.xlane.xlu1 %1031  ;;  %v1340_v13 = vld [vmem:[%s3399_s0 + $0x8] sm:$0xff] }
 0x428   : > { %v1036_v16 = vsub.f32 %v1021_v2, %v1032_v15 }
 0x429   : > { %v1040_v17 = vmul.f32 1.442695, %v1037_v14  ;;  %v1139_v14 = vld [vmem:[%s3399_s0] sm:$0xff] }
 0x42a   : > { %v1038_v18 = vmul.f32 1.442695, %v1036_v16 }
 0x42b   : > { %3168 = vpow2.f32 %v1040_v17 }
 0x42c   : > { %3170 = vpow2.f32 %v1038_v18 }
 0x42e   : > { %v1236_v19 = vpop.xlane.xlu1 %1235 }
 0x42f   : > { %v1238_v20 = vsub.f32 %v1228_v6, %v1236_v19  ;;  %v1233_v21 = vpop.xlane.xlu0 %1232 }
 0x430   : > { %v1237_v22 = vsub.f32 %v1223_v8, %v1233_v21 }
 0x431   : > { %v1241_v23 = vmul.f32 1.442695, %v1238_v20 }
 0x432   : > { %v1239_v24 = vmul.f32 1.442695, %v1237_v22 }
 0x433   : > { %3172 = vpow2.f32 %v1241_v23 }
 0x434   : > { %3174 = vpow2.f32 %v1239_v24 }
 0x435   : > { %v3169_v25 = vpop.eup %3168 }
 0x436   : > { %v3171_v26 = vpop.eup %3170  ;;  %v1045_v27 = vsel %vm1029_vm4, %v3169_v25, 0.0 }
 0x437   : > { %1046 = vadd.xlane.f32.xlu1 %v1045_v27  ;;  %v1042_v28 = vsel %vm1029_vm4, %v3171_v26, 0.0 }
 0x438   : > { %1043 = vadd.xlane.f32.xlu0 %v1042_v28 }
 0x43d   : > { %v3537_v29 = vpop.eup %3172 }
 0x43e   : > { %v3175_v30 = vpop.eup %3174  ;;  %v1246_v31 = vsel %vm1029_vm4, %v3537_v29, 0.0 }
 0x43f   : > { %1247 = vadd.xlane.f32.xlu1 %v1246_v31  ;;  %v1243_v32 = vsel %vm1029_vm4, %v3175_v30, 0.0 }
 0x440   : > { %1244 = vadd.xlane.f32.xlu0 %v1243_v32 }
 0x450   : > { %3149 = vrot.lane.b32.xlu1 %v3485_v43, %s3257_s29 }
 0x454   : > { %3154 = vrot.lane.b32.xlu1 %v3485_v43, %s3258_s30  ;;  %s3759_s30 = scalar_lea.vmem %s3717_s9, %s3384_s23 }
 0x456   : > { %3144 = vrot.lane.b32.xlu0 %v3485_v43, %s3259_s4 }
 0x458   : > { %1789 = vrot.lane.b32.xlu1 %v3476_v40, %s3260_s1 }
 0x45a   : > { %1787 = vrot.lane.b32.xlu0 %v3478_v42, %s3260_s1 }
 0x479   : > { %1595 = vmax.xlane.f32.xlu0 %v1594_v36 }
 0x47c   : > { %1598 = vmax.xlane.f32.xlu1 %v1597_v38 }
 0x48d   : > { %3159 = vrot.lane.b32.xlu1 %v3485_v43, %s3261_s16  ;;  %s3760_s16 = scalar_lea.vmem %s3719_s11, %s3384_s23 }
 0x491   : > { %3164 = vrot.lane.b32.xlu1 %v3485_v43, %s3262_s6 }
 0x4c4   : > { %v1047_v40 = vpop.xlane.xlu1 %1046 }
 0x4c5   : > { %v1044_v39 = vpop.xlane.xlu0 %1043 }
 0x4c6   : > { %3176 = vrcp.f32 %v1044_v39 }
 0x4c7   : > { %3178 = vrcp.f32 %v1047_v40 }
 0x4cc   : > { %v1248_v41 = vpop.xlane.xlu1 %1247 }
 0x4cd   : > { %v1245_v42 = vpop.xlane.xlu0 %1244 }
 0x4ce   : > { %3180 = vrcp.f32 %v1245_v42 }
 0x4cf   : > { %3182 = vrcp.f32 %v1248_v41 }
 0x4d0   : > { %v3177_v44 = vpop.eup %3176  ;;  %v3150_v45 = vpop.permute.xlu1 %3149 }
 0x4d1   : > { %v3145_v46 = vpop.permute.xlu0 %3144  ;;  %v1049_v48 = vmul.f32 %v3177_v44, %v3171_v26  ;;  %v3152_v49 = vunpack.i.h.bf16 %v3150_v45  ;;  %v3151_v50 = vunpack.i.l.bf16 %v3150_v45  ;;  %v3179_v54 = vpop.eup %3178 }
 0x4d2   : > { %v3147_v51 = vunpack.i.h.bf16 %v3145_v46  ;;  %v3146_v52 = vunpack.i.l.bf16 %v3145_v46  ;;  %v1051_v63 = vmul.f32 %v3179_v54, %v3169_v25 }
 0x4d3   : > { %2888 = vmatprep.mubr.msk.f32.mxu0 %vm1029_vm4, %v1049_v48  ;;  %v3029_v58 = vpack.c.bf16 %v3152_v49, %v3151_v50 }
 0x4d4   : > { %v3155_v53 = vpop.permute.xlu1 %3154  ;;  %v3019_v43 = vpack.c.bf16 %v3147_v51, %v3146_v52 }
 0x4d5   : > { %v3157_v55 = vunpack.i.h.bf16 %v3155_v53  ;;  %v3156_v56 = vunpack.i.l.bf16 %v3155_v53  ;;  %v1788_v57 = vpop.permute.xlu0 %1787 }
 0x4d6   : > { %3020 = vmatprep.subr.bf16.mxu0 %v3019_v43  ;;  %2938 = vmatprep.mubr.msk.f32.mxu1 %vm945_vm2, %v1788_v57 }
 0x4d7   : > { %v3043_v59 = vpack.c.bf16 %v3157_v55, %v3156_v56  ;;  %3022 = vmatpush3.bf16.msra.mxu0 %v3019_v43  ;;  %v1987_v43 = vld [vmem:[%s3399_s0 + $0x18] sm:$0xff] }
 0x4d8   : > { %v3181_v60 = vpop.eup %3180  ;;  %3030 = vmatprep.subr.bf16.mxu0 %v3029_v58  ;;  %v1790_v3 = vpop.permute.xlu1 %1789 }
 0x4d9   : > { %v3183_v0 = vpop.eup %3182  ;;  %3045 = vmatprep.subr.msk.bf16.mxu1 %vm3495_vm3, %v3043_v59  ;;  %v1250_v1 = vmul.f32 %v3181_v60, %v3175_v30 }
 0x4da   : > { %2889 = vmatmul.mubr.msk.f32.vlgmr.msra.gmra.mrb[0].mxu0 %vm1029_vm4, %v1051_v63  ;;  %3048 = vmatpush3.bf16.xpose.msk.msra.mxu1 %vm3495_vm3, %v3043_v59  ;;  %v1252_v2 = vmul.f32 %v3183_v0, %v3537_v29  ;;  %v2766_v0 = vld [vmem:[%s3757_s17] ss:$0 sm:$0xff] }
 0x4db   : > { %3032 = vmatpush3.bf16.msra.mxu0 %v3029_v58  ;;  %2902 = vmatprep.mubr.msk.f32.mxu0 %vm1029_vm4, %v1250_v1 }
 0x4dc   : > { %2905 = vmatprep.subr.mxu0 %v1340_v13 }
 0x4de   : > { %2903 = vmatmul.mubr.msk.f32.vlgmr.msra.gmra.mrb[2].mxu0 %vm1029_vm4, %v1252_v2 }
 0x4df   : > { %2906 = vmatpush3.msra.mxu0 %v1340_v13 }
 0x4e0   : > { %2910 = vmatprep.subr.mxu0 %v1139_v14 }
 0x4e1   : > { %2939 = vmatmul.mubr.msk.f32.vlgmr.msra.gmra.mrb[8].mxu1 %vm945_vm2, %v1790_v3 }
 0x506   : > { %v1596_v4 = vpop.xlane.xlu0 %1595 }
 0x507   : > { %v1600_v5 = vsub.f32 %v1586_v33, %v1596_v4  ;;  %v1703_v33 = vld [vmem:[%s3399_s0 + $0x10] sm:$0xff] }
 0x509   : > { %v1602_v6 = vmul.f32 1.442695, %v1600_v5  ;;  %v1599_v7 = vpop.xlane.xlu1 %1598 }
 0x50a   : > { %v1601_v8 = vsub.f32 %v1591_v34, %v1599_v7 }
 0x50b   : > { %3184 = vpow2.f32 %v1602_v6 }
 0x50c   : > { %v1604_v47 = vmul.f32 1.442695, %v1601_v8 }
 0x50d   : > { %v3160_v16 = vpop.permute.xlu1 %3159 }
 0x50e   : > { %3186 = vpow2.f32 %v1604_v47  ;;  %v3162_v20 = vunpack.i.h.bf16 %v3160_v16  ;;  %v3161_v21 = vunpack.i.l.bf16 %v3160_v16  ;;  %v2127_v16 = vld [vmem:[%s3416_s28] sm:$0xff] }
 0x510   : > { %v3039_v24 = vpack.c.bf16 %v3162_v20, %v3161_v21  ;;  %v2130_v20 = vld [vmem:[%s3416_s28 + $0x18] sm:$0xff] }
 0x511   : > { %v3165_v31 = vpop.permute.xlu1 %3164 }
 0x512   : > { %v3167_v34 = vunpack.i.h.bf16 %v3165_v31  ;;  %v3166_v36 = vunpack.i.l.bf16 %v3165_v31  ;;  %v2768_v31 = vld [vmem:[%s3759_s30] ss:$0 sm:$0xff] }
 0x515   : > { %v3185_v9 = vpop.eup %3184 }
 0x516   : > { %v1606_v10 = vsel %vm1029_vm4, %v3185_v9, 0.0 }
 0x517   : > { %1607 = vadd.xlane.f32.xlu0 %v1606_v10 }
 0x518   : > { %v3187_v11 = vpop.eup %3186 }
 0x519   : > { %v1609_v12 = vsel %vm1029_vm4, %v3187_v11, 0.0 }
 0x51b   : > { %1610 = vadd.xlane.f32.xlu0 %v1609_v12 }
 0x5a4   : > { %v1608_v15 = vpop.xlane.xlu0 %1607 }
 0x5a5   : > { %3188 = vrcp.f32 %v1608_v15 }
 0x5a8   : > { %v1611_v18 = vpop.xlane.xlu0 %1610 }
 0x5a9   : > { %3190 = vrcp.f32 %v1611_v18 }
 0x5ad   : > { %v2890_v17 = vpop.f32.mrb[0].mxu0 }
 0x5ae   : > { %v1130_v19 = vpop.f32.mrb[1].mxu0 }
 0x5af   : > { %v3189_v30 = vpop.eup %3188 }
 0x5b0   : > { %v1613_v39 = vmul.f32 %v3189_v30, %v3185_v9 }
 0x5b1   : > { %v2904_v22 = vpop.f32.mrb[2].mxu0 }
 0x5b2   : > { %v1331_v23 = vpop.f32.mrb[3].mxu0 }
 0x5b3   : > { %2907 = vmatprep.mubr.msk.f32.mxu0 %vm945_vm2, %v1331_v23  ;;  %v3191_v32 = vpop.eup %3190 }
 0x5b4   : > { %2908 = vmatmul.mubr.msk.f32.vlgmr.msra.gmra.mrb[4].mxu0 %vm945_vm2, %v2904_v22  ;;  %v2940_v25 = vpop.f32.mrb[8].mxu1  ;;  %v1615_v40 = vmul.f32 %v3191_v32, %v3187_v11 }
 0x5b5   : > { %2911 = vmatpush3.msra.mxu0 %v1139_v14  ;;  %2912 = vmatprep.mubr.msk.f32.mxu0 %vm945_vm2, %v1130_v19  ;;  %v1869_v26 = vpop.f32.mrb[9].mxu1  ;;  %v1875_v28 = vadd.f32 %v2940_v25, %v3520_v61  ;;  %v3049_v61 = vpack.c.bf16 %v3167_v34, %v3166_v36  ;;  %v2129_v19 = vld [vmem:[%s3416_s28 + $0x10] sm:$0xff] }
 0x5b6   : > { %3040 = vmatprep.subr.bf16.mxu0 %v3039_v24  ;;  %v1870_v27 = vadd.f32 %v1869_v26, %v3525_v62  ;;  %v3057_v21 = vpack.c.bf16 %v2130_v20, %v2129_v19 }
 0x5b7   : > { %v1881_v38 = vsel %vm1029_vm4, %v1875_v28, -inf }
 0x5b8   : > { %v1878_v29 = vsel %vm1029_vm4, %v1870_v27, -inf }
 0x5b9   : > { %1879 = vmax.xlane.f32.xlu0 %v1878_v29 }
 0x5bc   : > { %2913 = vmatmul.mubr.msk.f32.vlgmr.msra.gmra.mrb[4].mxu0 %vm945_vm2, %v2890_v17  ;;  %v2128_v17 = vld [vmem:[%s3416_s28 + $0x8] sm:$0xff]  ;;  %s3758_s28 = scalar_lea.vmem %s3716_s8, %s3384_s23 }
 0x5bd   : > { %3042 = vmatpush3.bf16.msra.mxu0 %v3039_v24  ;;  %1882 = vmax.xlane.f32.xlu0 %v1881_v38  ;;  %v3053_v18 = vpack.c.bf16 %v2128_v17, %v2127_v16  ;;  %v2767_v29 = vld [vmem:[%s3758_s28] ss:$0 sm:$0xff]  ;;  %s3763_s28 = sld [smem:[#allocation14_spill]] (!%p2777_p5) }
 0x5be   : > { %2926 = vmatprep.mubr.msk.f32.mxu0 %vm1029_vm4, %v1613_v39  ;;  %2929 = vmatprep.subr.mxu0 %v1703_v33 }
 0x5bf   : > { %3054 = vmatprep.subr.bf16.mxu1 %v3053_v18 }
 0x5c0   : > { %2927 = vmatmul.mubr.msk.f32.vlgmr.msra.gmra.mrb[6].mxu0 %vm1029_vm4, %v1615_v40  ;;  %3056 = vmatpush3.bf16.msra.mxu1 %v3053_v18  ;;  %v2237_v40 = vld [vmem:[%s3426_s20] sm:$0xff] }
 0x5c1   : > { %2930 = vmatpush3.msra.mxu0 %v1703_v33  ;;  %3058 = vmatprep.subr.bf16.mxu1 %v3057_v21 }
 0x5c2   : > { %3050 = vmatprep.subr.bf16.mxu0 %v3049_v61 }
 0x5c4   : > { %3060 = vmatpush3.bf16.msra.mxu1 %v3057_v21 }
 0x646   : > { %v1880_v62 = vpop.xlane.xlu0 %1879 }
 0x647   : > { %v1884_v41 = vsub.f32 %v1870_v27, %v1880_v62  ;;  %v2239_v62 = vld [vmem:[%s3426_s20 + $0x10] sm:$0xff] }
 0x649   : > { %v1886_v42 = vmul.f32 1.442695, %v1884_v41 }
 0x64a   : > { %v1883_v44 = vpop.xlane.xlu0 %1882 }
 0x64b   : > { %3192 = vpow2.f32 %v1886_v42  ;;  %v1885_v45 = vsub.f32 %v1875_v28, %v1883_v44  ;;  %v2240_v42 = vld [vmem:[%s3426_s20 + $0x18] sm:$0xff] }
 0x64c   : > { %v3065_v44 = vpack.c.bf16 %v2240_v42, %v2239_v62 }
 0x64d   : > { %v1888_v46 = vmul.f32 1.442695, %v1885_v45  ;;  %v2241_v45 = vld [vmem:[%s3426_s20 + $0x20] sm:$0xff] }
 0x64f   : > { %3194 = vpow2.f32 %v1888_v46  ;;  %v2242_v46 = vld [vmem:[%s3426_s20 + $0x28] sm:$0xff] }
 0x655   : > { %v3193_v48 = vpop.eup %3192 }
 0x656   : > { %v1890_v49 = vsel %vm1029_vm4, %v3193_v48, 0.0 }
 0x657   : > { %1891 = vadd.xlane.f32.xlu0 %v1890_v49  ;;  %v2243_v49 = vld [vmem:[%s3426_s20 + $0x30] sm:$0xff] }
 0x659   : > { %v3195_v50 = vpop.eup %3194 }
 0x65a   : > { %v1893_v51 = vsel %vm1029_vm4, %v3195_v50, 0.0 }
 0x65b   : > { %1894 = vadd.xlane.f32.xlu0 %v1893_v51 }
 0x693   : > { %v2928_v52 = vpop.f32.mrb[6].mxu0 }
 0x694   : > { %v1694_v53 = vpop.f32.mrb[7].mxu0 }
 0x695   : > { %2931 = vmatprep.mubr.msk.f32.mxu0 %vm945_vm2, %v1694_v53 }
 0x696   : > { %2932 = vmatmul.mubr.msk.f32.vlgmr.msra.gmra.mrb[4].mxu0 %vm945_vm2, %v2928_v52  ;;  %v2769_v52 = vld [vmem:[%s3760_s16] ss:$0 sm:$0xff]  ;;  %s3762_s16 = sld [smem:[#allocation15_spill]] (!%p2777_p5) }
 0x697   : > { %3052 = vmatpush3.bf16.msra.mxu0 %v3049_v61  ;;  %v2238_v61 = vld [vmem:[%s3426_s20 + $0x8] sm:$0xff] }
 0x698   : > { %2948 = vmatprep.subr.mxu0 %v1987_v43  ;;  %v3061_v41 = vpack.c.bf16 %v2238_v61, %v2237_v40 }
 0x6e4   : > { %v1892_v54 = vpop.xlane.xlu0 %1891 }
 0x6e5   : > { %3196 = vrcp.f32 %v1892_v54 }
 0x6e8   : > { %v1895_v55 = vpop.xlane.xlu0 %1894 }
 0x6e9   : > { %3198 = vrcp.f32 %v1895_v55 }
 0x6ef   : > { %v3197_v56 = vpop.eup %3196 }
 0x6f0   : > { %v1897_v57 = vmul.f32 %v3197_v56, %v3193_v48  ;;  %v3069_v48 = vpack.c.bf16 %v2242_v46, %v2241_v45  ;;  %v2391_v45 = vld [vmem:[%s3761_s24] sm:$0xff] (!%p2777_p5)  ;;  %v2392_v46 = vld [vmem:[%s3761_s24 + $0x8] sm:$0xff] (!%p2777_p5) }
 0x6f2   : > { %2945 = vmatprep.mubr.msk.f32.mxu0 %vm1029_vm4, %v1897_v57 }
 0x6f3   : > { %v3199_v58 = vpop.eup %3198 }
 0x6f4   : > { %v1899_v59 = vmul.f32 %v3199_v58, %v3195_v50  ;;  %v2244_v50 = vld [vmem:[%s3426_s20 + $0x38] sm:$0xff] }
 0x6f5   : > { %v3073_v51 = vpack.c.bf16 %v2244_v50, %v2243_v49  ;;  %v3263_v49 = vmov (!%p2777_p5), 0.0|0.0   ;;  %v3078_v50 = vpack.c.bf16 (!%p2777_p5), %v2392_v46, %v2391_v45 }
 0x6f6   : > { %2946 = vmatmul.mubr.msk.f32.vlgmr.msra.gmra.mrb[8].mxu0 %vm1029_vm4, %v1899_v59  ;;  %3083 = vmatprep.subr.bf16.mxu1 (!%p2777_p5), %v3263_v49 }
 0x6f7   : > { %2949 = vmatpush3.msra.mxu0 %v1987_v43 }
 0x6f8   : > { %3062 = vmatprep.subr.bf16.mxu0 %v3061_v41 }
 0x7c9   : > { %v2947_v60 = vpop.f32.mrb[8].mxu0 }
 0x7ca   : > { %v1978_v63 = vpop.f32.mrb[9].mxu0 }
 0x7cb   : > { %2950 = vmatprep.mubr.msk.f32.mxu0 %vm945_vm2, %v1978_v63 }
 0x7cc   : > { %2951 = vmatmul.mubr.msk.f32.vlgmr.msra.gmra.mrb[4].mxu0 %vm945_vm2, %v2947_v60 }
 0x7cd   : > { %3064 = vmatpush3.bf16.msra.mxu0 %v3061_v41 }
 0x7ce   : > { %3066 = vmatprep.subr.bf16.mxu0 %v3065_v44 }
 0x7d1   : > { %3068 = vmatpush3.bf16.msra.mxu0 %v3065_v44 }
 0x7d2   : > { %3070 = vmatprep.subr.bf16.mxu0 %v3069_v48 }
 0x7d5   : > { %3072 = vmatpush3.bf16.msra.mxu0 %v3069_v48  ;;  %v2393_v48 = vld [vmem:[%s3761_s24 + $0x10] sm:$0xff] (!%p2777_p5) }
 0x7d6   : > { %3074 = vmatprep.subr.bf16.mxu0 %v3073_v51 }
 0x7d9   : > { %3076 = vmatpush3.bf16.msra.mxu0 %v3073_v51  ;;  %v2394_v51 = vld [vmem:[%s3761_s24 + $0x18] sm:$0xff] (!%p2777_p5) }
 0x7da   : > { %3077 = vmatprep.subr.bf16.mxu0 (!%p2777_p5), %v3263_v49 }
 0x89f   : > { %v2952_v1 = vpop.f32.mrb[4].mxu0 }
 0x8a0   : > { %v2079_v2 = vadd.f32 %v2952_v1, %v2766_v0  ;;  %v2060_v3 = vpop.f32.mrb[5].mxu0 }
 0x8a1   : > { %v2078_v4 = vadd.f32 %v2766_v0, %v2060_v3 }
 0x8a2   : > { %v2081_v5 = vadd.f32 %v2079_v2, %v3467_v37 }
 0x8a3   : > { %v2080_v6 = vadd.f32 %v2078_v4, %v3463_v35 }
 0x8a4   : > { %v2087_v7 = vsel %vm855_vm1, %v2081_v5, 0.0 }
 0x8a5   : > { %2088 = vadd.xlane.f32.xlu1 %v2087_v7  ;;  %v2084_v8 = vsel %vm855_vm1, %v2080_v6, 0.0 }
 0x8a6   : > { %2085 = vadd.xlane.f32.xlu0 %v2084_v8 }
 0x932   : > { %v2089_v47 = vpop.xlane.xlu1 %2088 }
 0x933   : > { %v2092_v9 = vmul.f32 0.03125, %v2089_v47  ;;  %v2086_v10 = vpop.xlane.xlu0 %2085 }
 0x934   : > { %v2091_v11 = vmul.f32 0.03125, %v2086_v10 }
 0x935   : > { %v2094_v12 = vsub.f32 %v2081_v5, %v2092_v9 }
 0x936   : > { %v2093_v13 = vsub.f32 %v2080_v6, %v2091_v11  ;;  %v2772_v11 = vld [vmem:[%s781_s2] ss:$0 sm:$0xff] }
 0x937   : > { %v2096_v35 = vmul.f32 %v2094_v12, %v2094_v12 }
 0x938   : > { %v2095_v14 = vmul.f32 %v2093_v13, %v2093_v13 }
 0x939   : > { %v2100_v15 = vsel %vm855_vm1, %v2096_v35, 0.0 }
 0x93a   : > { %v2097_v37 = vsel %vm855_vm1, %v2095_v14, 0.0 }
 0x93b   : > { %2098 = vadd.xlane.f32.xlu0 %v2097_v37 }
 0x93f   : > { %2101 = vadd.xlane.f32.xlu0 %v2100_v15 }
 0x9c8   : > { %v2099_v22 = vpop.xlane.xlu0 %2098 }
 0x9c9   : > { %v2103_v23 = vmul.f32 0.03125, %v2099_v22 }
 0x9cb   : > { %v2105_v24 = vadd.f32 1e-12, %v2103_v23 }
 0x9cc   : > { %v2102_v25 = vpop.xlane.xlu0 %2101 }
 0x9cd   : > { %3200 = vrsqrt.f32 %v2105_v24  ;;  %v2104_v26 = vmul.f32 0.03125, %v2102_v25 }
 0x9cf   : > { %v2106_v27 = vadd.f32 1e-12, %v2104_v26 }
 0x9d1   : > { %3202 = vrsqrt.f32 %v2106_v27 }
 0x9d7   : > { %v3201_v28 = vpop.eup %3200 }
 0x9d8   : > { %v2109_v30 = vmul.f32 %v3201_v28, %v2093_v13 }
 0x9da   : > { %v2117_v32 = vmul.f32 %v2767_v29, %v2109_v30 }
 0x9db   : > { %v3203_v33 = vpop.eup %3202 }
 0x9dc   : > { %v2110_v34 = vmul.f32 %v3203_v33, %v2094_v12  ;;  %v2125_v36 = vadd.f32 %v2768_v31, %v2117_v32 }
 0x9de   : > { %v2118_v38 = vmul.f32 %v2767_v29, %v2110_v34  ;;  %2961 = vmatprep.mubr.msk.f32.mxu1 %vm855_vm1, %v2125_v36 }
 0x9e0   : > { %v2126_v39 = vadd.f32 %v2768_v31, %v2118_v38 }
 0x9e2   : > { %2962 = vmatmul.mubr.msk.f32.vlgmr.msra.gmra.mrb[10].mxu1 %vm855_vm1, %v2126_v39 }
 0xab5   : > { %v2963_v53 = vpop.f32.mrb[10].mxu1 }
 0xab6   : > { %v2216_v43 = vadd.f32 %v2963_v53, %v2769_v52  ;;  %v2210_v54 = vpop.f32.mrb[11].mxu1  ;;  %v3081_v53 = vpack.c.bf16 (!%p2777_p5), %v2394_v51, %v2393_v48 }
 0xab7   : > { %v2211_v55 = vadd.f32 %v2769_v52, %v2210_v54  ;;  %v3265_v52 = vmov (!%p2777_p5), 0.0  }
 0xab8   : > { %v2222_v56 = vmul.f32 0.044715, %v2216_v43  ;;  %v2220_v47 = vmul.f32 0.5, %v2216_v43  ;;  %3002 = vmatprep.mubr.msk.f32.mxu1 (!%p2777_p5), %vm3264_vm6, %v3265_v52 }
 0xab9   : > { %v2221_v57 = vmul.f32 0.044715, %v2211_v55  ;;  %v2219_v7 = vmul.f32 0.5, %v2211_v55 }
 0xaba   : > { %v2224_v58 = vmul.f32 %v2222_v56, %v2216_v43  ;;  %v2477_v56 = vld [vmem:[%s3762_s16 + $0x8] sm:$0xff] (!%p2777_p5) }
 0xabb   : > { %v2223_v59 = vmul.f32 %v2221_v57, %v2211_v55  ;;  %v2478_v57 = vld [vmem:[%s3762_s16 + $0x10] sm:$0xff] (!%p2777_p5) }
 0xabc   : > { %v2226_v60 = vmul.f32 %v2224_v58, %v2216_v43 }
 0xabd   : > { %v2225_v63 = vmul.f32 %v2223_v59, %v2211_v55  ;;  %v2479_v59 = vld [vmem:[%s3762_s16 + $0x18] sm:$0xff] (!%p2777_p5) }
 0xabe   : > { %v2228_v0 = vadd.f32 %v2226_v60, %v2216_v43  ;;  %v3087_v60 = vpack.c.bf16 (!%p2777_p5), %v2479_v59, %v2478_v57 }
 0xabf   : > { %v2227_v1 = vadd.f32 %v2225_v63, %v2211_v55  ;;  %v2476_v55 = vld [vmem:[%s3762_s16] sm:$0xff] (!%p2777_p5) }
 0xac0   : > { %v2230_v2 = vmul.f32 0.7978846, %v2228_v0  ;;  %v3084_v58 = vpack.c.bf16 (!%p2777_p5), %v2477_v56, %v2476_v55  ;;  %v2778_v63 = vld [vmem:[%s3763_s28] ss:$0 sm:$0xff] (!%p2777_p5) }
 0xac1   : > { %v2229_v3 = vmul.f32 0.7978846, %v2227_v1 }
 0xac2   : > { %3204 = vtanh.f32 %v2230_v2  ;;  %3085 = vmatpush3.bf16.msra.mxu1 (!%p2777_p5), %v3084_v58 }
 0xac3   : > { %3206 = vtanh.f32 %v2229_v3  ;;  %3086 = vmatprep.subr.bf16.mxu1 (!%p2777_p5), %v3263_v49 }
 0xac6   : > { %3088 = vmatpush3.bf16.msra.mxu1 (!%p2777_p5), %v3087_v60 }
 0xacc   : > { %v3205_v4 = vpop.eup %3204 }
 0xacd   : > { %v3207_v5 = vpop.eup %3206  ;;  %v2234_v6 = vadd.f32 1.0, %v3205_v4  ;;  %v2780_v4 = vld [vmem:[%s3764_s27] ss:$0 sm:$0xff] (!%p2777_p5) }
 0xace   : > { %v2233_v8 = vadd.f32 1.0, %v3207_v5 }
 0xacf   : > { %v2236_v10 = vmul.f32 %v2234_v6, %v2220_v47 }
 0xad0   : > { %v2235_v9 = vmul.f32 %v2233_v8, %v2219_v7 }
 0xad2   : > { %2980 = vmatprep.mubr.msk.f32.mxu0 %vm2252_vm5, %v2235_v9 }
 0xad3   : > { %2981 = vmatmul.mubr.msk.f32.vlgmr.msra.gmra.mrb[10].mxu0 %vm2252_vm5, %v2236_v10 }
 0xad4   : > { %2991 = vmatprep.mubr.msk.f32.mxu0 (!%p2777_p5), %vm3264_vm6, %v3265_v52  ;;  %3079 = vmatpush3.bf16.msra.mxu0 (!%p2777_p5), %v3078_v50 }
 0xad5   : > { %3080 = vmatprep.subr.bf16.mxu0 (!%p2777_p5), %v3263_v49 }
 0xad8   : > { %3082 = vmatpush3.bf16.msra.mxu0 (!%p2777_p5), %v3081_v53 }
 0xba6   : > { %v2982_v12 = vpop.f32.mrb[10].mxu0 }
 0xba7   : > { %v2325_v13 = vpop.f32.mrb[11].mxu0  ;;  %v2331_v14 = vadd.f32 %v2982_v12, %v2772_v11 }
 0xba8   : > { %v2326_v37 = vadd.f32 %v2772_v11, %v2325_v13 }
 0xba9   : > { %v2335_v16 = vadd.f32 %v2331_v14, %v2126_v39  ;;  %v2776_v39 = vld [vmem:[%s787_s18] ss:$0 sm:$0xff] }
 0xbaa   : > { %v2334_v35 = vadd.f32 %v2326_v37, %v2125_v36  ;;  %v2775_v36 = vld [vmem:[%s784_s26] ss:$0 sm:$0xff] }
 0xbab   : > { %v2341_v17 = vsel %vm855_vm1, %v2335_v16, 0.0 }
 0xbac   : > { %v2338_v15 = vsel %vm855_vm1, %v2334_v35, 0.0 }
 0xbad   : > { %2339 = vadd.xlane.f32.xlu0 %v2338_v15 }
 0xbb1   : > { %2342 = vadd.xlane.f32.xlu0 %v2341_v17 }
 0xc3a   : > { %v2340_v18 = vpop.xlane.xlu0 %2339 }
 0xc3b   : > { %v2344_v19 = vmul.f32 0.03125, %v2340_v18 }
 0xc3d   : > { %v2346_v20 = vsub.f32 %v2334_v35, %v2344_v19 }
 0xc3e   : > { %v2343_v21 = vpop.xlane.xlu0 %2342 }
 0xc3f   : > { %v2345_v22 = vmul.f32 0.03125, %v2343_v21  ;;  %v2348_v23 = vmul.f32 %v2346_v20, %v2346_v20 }
 0xc41   : > { %v2347_v24 = vsub.f32 %v2335_v16, %v2345_v22  ;;  %v2350_v25 = vsel %vm855_vm1, %v2348_v23, 0.0 }
 0xc42   : > { %2351 = vadd.xlane.f32.xlu0 %v2350_v25 }
 0xc43   : > { %v2349_v26 = vmul.f32 %v2347_v24, %v2347_v24 }
 0xc45   : > { %v2353_v27 = vsel %vm855_vm1, %v2349_v26, 0.0 }
 0xc46   : > { %2354 = vadd.xlane.f32.xlu0 %v2353_v27 }
 0xccf   : > { %v2352_v28 = vpop.xlane.xlu0 %2351 }
 0xcd0   : > { %v2356_v29 = vmul.f32 0.03125, %v2352_v28 }
 0xcd2   : > { %v2358_v30 = vadd.f32 1e-12, %v2356_v29 }
 0xcd3   : > { %v2355_v31 = vpop.xlane.xlu0 %2354 }
 0xcd4   : > { %3208 = vrsqrt.f32 %v2358_v30  ;;  %v2357_v32 = vmul.f32 0.03125, %v2355_v31 }
 0xcd6   : > { %v2359_v33 = vadd.f32 1e-12, %v2357_v32 }
 0xcd8   : > { %3210 = vrsqrt.f32 %v2359_v33 }
 0xcde   : > { %v3209_v34 = vpop.eup %3208 }
 0xcdf   : > { %v2362_v38 = vmul.f32 %v3209_v34, %v2346_v20 }
 0xce1   : > { %v2370_v40 = vmul.f32 %v2775_v36, %v2362_v38 }
 0xce2   : > { %v3211_v61 = vpop.eup %3210 }
 0xce3   : > { %v2378_v62 = vadd.f32 %v2776_v39, %v2370_v40  ;;  %v2363_v41 = vmul.f32 %v3211_v61, %v2347_v24  ;;  %2385 = sbr.rel (%p2777_p5) target bundleno = 3748 (0xea4), region = 108 }
 0xce5   : > { %2380 = vst.msk [vmem:[#allocation2] sm:$0xff] %vm855_vm1, %v2378_v62  ;;  %v2371_v42 = vmul.f32 %v2775_v36, %v2363_v41 }
 0xce7   : > { %v2379_v44 = vadd.f32 %v2776_v39, %v2371_v42 }
 0xce9   : > { %2381 = vst.msk [vmem:[#allocation2 + $0x8] sm:$0xff] %vm855_vm1, %v2379_v44  ;;  %v2387_v43 = vrot.slane (!%p2777_p5), %v2379_v44, 7 }
 0xceb   : > { %v2390_v54 = vsel %vm2389_vm7, %v2378_v62, %v2387_v43 }
 0xcec   : > { %2992 = vmatmul.mubr.msk.f32.vlgmr.msra.gmra.mrb[0].mxu0 %vm855_vm1, %v2390_v54 }
 0xdbf   : > { %v2471_v0 = vpop.f32.mrb[0].mxu0 }
 0xdc0   : > { %v2472_v1 = vadd.f32 %v2778_v63, %v2471_v0  ;;  %v2993_v2 = vpop.f32.mrb[1].mxu0 }
 0xdc2   : > { %3212 = vtanh.f32 %v2472_v1 }
 0xdcc   : > { %v3213_v3 = vpop.eup %3212 }
 0xdcd   : > { %3003 = vmatmul.mubr.msk.f32.vlgmr.msra.gmra.mrb[0].mxu1 %vm855_vm1, %v3213_v3 }
 0xea0   : > { %v2556_v5 = vpop.f32.mrb[0].mxu1 }
 0xea1   : > { %v2557_v6 = vadd.f32 %v2780_v4, %v2556_v5  ;;  %v3004_v7 = vpop.f32.mrb[1].mxu1 }
 0xea3   : > { %2561 = vst.msk [vmem:[#allocation3] sm:$0x3] %vm2560_vm8, %v2557_v6 }
 0xea4 PF: > { %p3099_p6 = scmp.eq.s32.totalorder %s3378_s22, 1  ;;  %s3266_s29 = smov [#allocation3]  }
 0xea5   : > { %s2569_s30 = sshll.u32 %s3266_s29, 4  ;;  %s2570_s30 = int_to_ptr.vmem [resolvable:$true] %s2569_s30 }
 0xea6   : > { %s3214_s4 = scalar_lea.vmem %s2570_s30, 32  ;;  %p3221_p10 = scmp.lt.s32.totalorder %s2570_s30, %s2570_s30 }
 0xea7   : > { %p3215_p7 = scmp.ne.s32.totalorder %s2570_s30, %s3214_s4  ;;  %p3222_p11 = scmp.lt.s32.totalorder %s3214_s4, %s3214_s4 }
 0xea9   : > { %p3216_p8 = pnand %p3215_p7, %p3099_p6  ;;  %p3223_p12 = por %p3222_p11, %p3221_p10 }
 0xeab   : > { %p3217_p9 = pneg %p3216_p8 }
 0xead   : > { %p3224_p13 = pnand %p3223_p12, %p3217_p9 }
 0xeaf   : > { %3227 = shalt.err (!%p3224_p13)
}
 0xeb0   : > { %s3765_s6 = sld [smem:[#allocation17_spill]] }
 0xeb6   : > { %s3228_s2 = scalar_lea.hbm %s3765_s6, 32 }
 0xeb7   : > { %p3229_p0 = scmp.ne.s32.totalorder %s3765_s6, %s3228_s2  ;;  %p3234_p3 = scmp.lt.u32.totalorder %s3228_s2, %s3765_s6 }
 0xeb9   : > { %p3230_p1 = pnand %p3229_p0, %p3099_p6 }
 0xebb   : > { %p3231_p2 = pneg %p3230_p1 }
 0xebd   : > { %p3236_p4 = pnand %p3234_p3, %p3231_p2 }
 0xebf   : > { %3239 = shalt.err (!%p3236_p4)
}
 0xec0   : > { %3096 = dma.vmem_to_hbm [thread:$0]  (%p3099_p6), %s2570_s30, 32, %s3765_s6, [#allocation4]  }
 0xec1   : > { %3245 = dma.done.wait (%p3099_p6), [#allocation4], 32  }
 0xec2   : > { %3247 = vsyncadd (%p3099_p6), [#allocation4], 4294967264 }
 0xec3 PF: > { %s3766_s23 = sld [smem:[#allocation6_spill]] }
 0xec9   : > { %s31_s1 = sadd.s32 1, %s3766_s23  }
 0xeca   : > { %p28_p5 = scmp.ge.s32.totalorder %s31_s1, 4  }
 0xecc   :  { %30 = sbr.rel (!%p28_p5) target bundleno = 13 (0xd), region = 168 }
 0xed3   :  { %2582 = vsyncpa [#allocation4], 1 }
 0xed4   :  { %2584 = vsyncpa [#allocation4 + $0x1], 1 }

</bundles_post_ra>
